<compile_context>
chip_gen: v6e
topology: v6e:2x2x1
jax: 0.10.0
libtpu: 0.0.40
codegen_flags: <defaults>
</compile_context>

<pallas_src>
import functools

import jax
import jax.numpy as jnp
from jax import lax
from jax.experimental import pallas as pl
from jax.experimental.pallas import tpu as pltpu


FPAD = 128   # lane-dense feature width: every feature axis is padded to 128
NODE_PAD = 128  # node axis padded to a multiple of 128 (adj contraction lane-dense)


# ---------------------------------------------------------------------------
# Fused Pallas kernel: fc1 + n_layers GraphConvolutions, fully VMEM resident.
# ---------------------------------------------------------------------------
def _gcn_fused_kernel(x_ref, adj_ref, fc1_w_ref, fc1_b_ref,
                      gcn_w_ref, gcn_b_ref, o_ref, *, n_layers):
    bf16 = jnp.bfloat16

    # fc1:  h = x @ W + b   (dropout(training=False) -> identity).
    # x / W already bf16; accumulate in f32 on the MXU.
    h = jnp.dot(x_ref[...], fc1_w_ref[...],
                preferred_element_type=jnp.float32) + fc1_b_ref[...]

    adj = adj_ref[...]                         # bf16 [NPAD, NPAD]

    # GraphConvolution stack (statically unrolled; n_layers is tiny).
    for i in range(n_layers):
        w = gcn_w_ref[i]                       # bf16 [FPAD, FPAD], zero-padded
        b = gcn_b_ref[i]                       # f32  [1, FPAD],   zero-padded
        support = jnp.dot(h.astype(bf16), w,
                          preferred_element_type=jnp.float32) + b
        y = jnp.dot(adj, support.astype(bf16),
                    preferred_element_type=jnp.float32)

        # F.normalize(y, p=2, dim=1, eps=1e-12). Padded columns/rows are exactly
        # zero, so they do not contribute to the row norm. rsqrt -> EUP slot.
        sumsq = jnp.sum(y * y, axis=1, keepdims=True)
        y = y * lax.rsqrt(jnp.maximum(sumsq, 1e-24))

        # active = F.relu
        y = jnp.maximum(y, 0.0)

        # residue=True for every layer except the last (hidden -> n_class).
        if i < n_layers - 1:
            y = y + h
        h = y

    o_ref[...] = h.astype(o_ref.dtype)         # full-lane [NPAD, 128] store


# ---------------------------------------------------------------------------
# One-time preparation (hoisted OUT of the per-call hot path).
# ---------------------------------------------------------------------------
def _round_up(n, m):
    return ((n + m - 1) // m) * m


def _pad2(a, rows, cols, dtype=None):
    r, c = a.shape
    a = jnp.pad(a, ((0, rows - r), (0, cols - c)))
    return a if dtype is None else a.astype(dtype)


def prepare_params(params):
    """Pad / stack / bf16-convert weights once, outside the hot path."""
    hidden = params["fc1_w"].shape[1]
    fc1_w_p = _pad2(params["fc1_w"], FPAD, FPAD, jnp.bfloat16)
    fc1_b_p = jnp.pad(params["fc1_b"], (0, FPAD - hidden)).reshape(1, FPAD)
    fc1_b_p = fc1_b_p.astype(jnp.float32)
    gcn_w_p = jnp.stack([_pad2(w, FPAD, FPAD, jnp.bfloat16)
                         for w in params["gcn_w"]])
    gcn_b_p = jnp.stack(
        [jnp.pad(b, (0, FPAD - b.shape[0])).reshape(1, FPAD)
         for b in params["gcn_b"]]).astype(jnp.float32)
    return fc1_w_p, fc1_b_p, gcn_w_p, gcn_b_p


def prepare_inputs(x, adj1):
    """Pad node/feature axes once: x -> [NPAD, 128] bf16, adj -> [NPAD, NPAD] bf16."""
    n = x.shape[0]
    npad = _round_up(n, NODE_PAD)
    x_p = _pad2(x, npad, FPAD, jnp.bfloat16)
    adj_p = _pad2(adj1, npad, npad, jnp.bfloat16)
    return x_p, adj_p


# ---------------------------------------------------------------------------
# Hot path: single pallas_call over already-prepared arrays.
# ---------------------------------------------------------------------------
def gcn_forward_pallas(x_p, adj_p, fc1_w_p, fc1_b_p, gcn_w_p, gcn_b_p,
                       *, n_layers, n_nodes, n_class):
    npad = x_p.shape[0]
    vmem = pl.BlockSpec(memory_space=pltpu.MemorySpace.VMEM)
    out = pl.pallas_call(
        functools.partial(_gcn_fused_kernel, n_layers=n_layers),
        out_shape=jax.ShapeDtypeStruct((npad, FPAD), jnp.float32),
        in_specs=[vmem, vmem, vmem, vmem, vmem, vmem],
        out_specs=vmem,
    )(x_p, adj_p, fc1_w_p, fc1_b_p, gcn_w_p, gcn_b_p)
    return out[:n_nodes, :n_class]


# ---------------------------------------------------------------------------
# Parameter construction (PyTorch Linear weights pre-transposed to [in, out]).
# ---------------------------------------------------------------------------
def init_gcn_params(key, input_dim, hidden_dim, n_class, n_layers,
                    dtype=jnp.float32):
    keys = jax.random.split(key, 2 * (n_layers + 1))

    def glorot(k, shape):
        lim = (6.0 / (shape[0] + shape[1])) ** 0.5
        return jax.random.uniform(k, shape, dtype, -lim, lim)

    params = {
        "fc1_w": glorot(keys[0], (input_dim, hidden_dim)),
        "fc1_b": 0.01 * jax.random.normal(keys[1], (hidden_dim,), dtype),
    }
    gcn_w, gcn_b = [], []
    for i in range(n_layers):
        f_out = hidden_dim if i < n_layers - 1 else n_class
        gcn_w.append(glorot(keys[2 + 2 * i], (hidden_dim, f_out)))
        gcn_b.append(0.01 * jax.random.normal(keys[3 + 2 * i], (f_out,), dtype))
    params["gcn_w"] = gcn_w
    params["gcn_b"] = gcn_b
    return params


# ---------------------------------------------------------------------------
# Pure-JAX references (ground truth for the checks).
# ---------------------------------------------------------------------------
def ref_forward_f32(params, inputs, n_layers):
    x, adj1, _ = inputs
    h = x @ params["fc1_w"] + params["fc1_b"]
    for i in range(n_layers):
        s = h @ params["gcn_w"][i] + params["gcn_b"][i]
        y = adj1 @ s
        y = y / jnp.maximum(jnp.linalg.norm(y, axis=1, keepdims=True), 1e-12)
        y = jnp.maximum(y, 0.0)
        if i < n_layers - 1:
            y = y + h
        h = y
    return h


def ref_forward_bf16(params, inputs, n_layers):
    """Same math as the kernel (bf16 MXU feeds, f32 accumulation/elementwise)."""
    x, adj1, _ = inputs
    bf = jnp.bfloat16
    adj = adj1.astype(bf)
    h = jnp.dot(x.astype(bf), params["fc1_w"].astype(bf),
                preferred_element_type=jnp.float32) + params["fc1_b"]
    for i in range(n_layers):
        s = jnp.dot(h.astype(bf), params["gcn_w"][i].astype(bf),
                    preferred_element_type=jnp.float32) + params["gcn_b"][i]
        y = jnp.dot(adj, s.astype(bf), preferred_element_type=jnp.float32)
        y = y * lax.rsqrt(jnp.maximum(jnp.sum(y * y, axis=1, keepdims=True),
                                      1e-24))
        y = jnp.maximum(y, 0.0)
        if i < n_layers - 1:
            y = y + h
        h = y
    return h


# ---------------------------------------------------------------------------
if __name__ == "__main__":
    n_layers = 3
    input_dim = 16
    hidden_dim = 32
    n_class = 4
    N = 64  # number of graph nodes

    key = jax.random.PRNGKey(0)
    k_x, k_adj, k_p = jax.random.split(key, 3)

    x = jax.random.normal(k_x, (N, input_dim), jnp.float32)
    # symmetric, row-normalized dense adjacency
    a = jax.random.uniform(k_adj, (N, N), jnp.float32)
    a = 0.5 * (a + a.T) + jnp.eye(N, dtype=jnp.float32)
    adj1 = a / jnp.sum(a, axis=1, keepdims=True)
    adj2 = adj1  # present in the input tuple, unused by forward()

    params = init_gcn_params(k_p, input_dim, hidden_dim, n_class, n_layers)

    # One-time preparation (padding / stacking / bf16 conversion) — hoisted out
    # of the jitted hot path per the performance review.
    fc1_w_p, fc1_b_p, gcn_w_p, gcn_b_p = prepare_params(params)
    x_p, adj_p = prepare_inputs(x, adj1)

    fwd = jax.jit(functools.partial(gcn_forward_pallas, n_layers=n_layers,
                                    n_nodes=N, n_class=n_class))
    out = jax.block_until_ready(
        fwd(x_p, adj_p, fc1_w_p, fc1_b_p, gcn_w_p, gcn_b_p))

    assert out.shape == (N, n_class), out.shape
    assert out.dtype == jnp.float32

    # (1) Kernel faithfully implements the bf16-MXU math.
    ref_b = ref_forward_bf16(params, (x, adj1, adj2), n_layers)
    err_b = float(jnp.max(jnp.abs(out - ref_b)))
    assert err_b < 3e-3, err_b

    # (2) Drift vs. full-f32 module semantics stays small (bf16 MXU feeds).
    ref_f = ref_forward_f32(params, (x, adj1, adj2), n_layers)
    err_f = float(jnp.max(jnp.abs(out - ref_f)))
    assert err_f < 7.5e-2, err_f

    print("KERNEL_OK")
</pallas_src>

<mosaic_0001>
module attributes {stable_mosaic.version = 11 : i64} {
  func.func @_gcn_fused_kernel(%arg0: memref<128x128xbf16, #tpu.memory_space<vmem>>, %arg1: memref<128x128xbf16, #tpu.memory_space<vmem>>, %arg2: memref<128x128xbf16, #tpu.memory_space<vmem>>, %arg3: memref<1x128xf32, #tpu.memory_space<vmem>>, %arg4: memref<3x128x128xbf16, #tpu.memory_space<vmem>>, %arg5: memref<3x1x128xf32, #tpu.memory_space<vmem>>, %arg6: memref<128x128xf32, #tpu.memory_space<vmem>>) attributes {dimension_semantics = [], scalar_prefetch = 0 : i64, scratch_operands = 0 : i64, tpu.core_type = #tpu.core_type<tc>} {
    %c0 = arith.constant 0 : index
    %c0_0 = arith.constant 0 : index
    %0 = vector.load %arg0[%c0, %c0_0] : memref<128x128xbf16, #tpu.memory_space<vmem>>, vector<128x128xbf16>
    %c0_1 = arith.constant 0 : index
    %c0_2 = arith.constant 0 : index
    %1 = vector.load %arg2[%c0_1, %c0_2] : memref<128x128xbf16, #tpu.memory_space<vmem>>, vector<128x128xbf16>
    %cst = arith.constant dense<0.000000e+00> : vector<128x128xf32>
    %2 = tpu.matmul %0, %1, %cst {dimension_numbers = #tpu.dot_dimension_numbers<[1], [0], [0], [1], [0, 0, 1, 1], [], []>} : vector<128x128xbf16>, vector<128x128xbf16>, vector<128x128xf32> -> vector<128x128xf32>
    %c0_3 = arith.constant 0 : index
    %c0_4 = arith.constant 0 : index
    %3 = vector.load %arg3[%c0_3, %c0_4] : memref<1x128xf32, #tpu.memory_space<vmem>>, vector<1x128xf32>
    %4 = vector.broadcast %3 : vector<1x128xf32> to vector<128x128xf32>
    %5 = arith.addf %2, %4 : vector<128x128xf32>
    %c0_5 = arith.constant 0 : index
    %c0_6 = arith.constant 0 : index
    %6 = vector.load %arg1[%c0_5, %c0_6] : memref<128x128xbf16, #tpu.memory_space<vmem>>, vector<128x128xbf16>
    %c0_7 = arith.constant 0 : index
    %c0_8 = arith.constant 0 : index
    %c0_9 = arith.constant 0 : index
    %7 = vector.load %arg4[%c0_7, %c0_8, %c0_9] : memref<3x128x128xbf16, #tpu.memory_space<vmem>>, vector<1x128x128xbf16>
    %8 = vector.shape_cast %7 : vector<1x128x128xbf16> to vector<128x128xbf16>
    %c0_10 = arith.constant 0 : index
    %c0_11 = arith.constant 0 : index
    %c0_12 = arith.constant 0 : index
    %9 = vector.load %arg5[%c0_10, %c0_11, %c0_12] : memref<3x1x128xf32, #tpu.memory_space<vmem>>, vector<1x1x128xf32>
    %10 = vector.shape_cast %9 : vector<1x1x128xf32> to vector<1x128xf32>
    %11 = arith.truncf %5 : vector<128x128xf32> to vector<128x128xbf16>
    %cst_13 = arith.constant dense<0.000000e+00> : vector<128x128xf32>
    %12 = tpu.matmul %11, %8, %cst_13 {dimension_numbers = #tpu.dot_dimension_numbers<[1], [0], [0], [1], [0, 0, 1, 1], [], []>} : vector<128x128xbf16>, vector<128x128xbf16>, vector<128x128xf32> -> vector<128x128xf32>
    %13 = vector.broadcast %10 : vector<1x128xf32> to vector<128x128xf32>
    %14 = arith.addf %12, %13 : vector<128x128xf32>
    %15 = arith.truncf %14 : vector<128x128xf32> to vector<128x128xbf16>
    %cst_14 = arith.constant dense<0.000000e+00> : vector<128x128xf32>
    %16 = tpu.matmul %6, %15, %cst_14 {dimension_numbers = #tpu.dot_dimension_numbers<[1], [0], [0], [1], [0, 0, 1, 1], [], []>} : vector<128x128xbf16>, vector<128x128xbf16>, vector<128x128xf32> -> vector<128x128xf32>
    %17 = arith.mulf %16, %16 : vector<128x128xf32>
    %cst_15 = arith.constant dense<0.000000e+00> : vector<128xf32>
    %18 = vector.multi_reduction <add>, %17, %cst_15 [1] : vector<128x128xf32> to vector<128xf32>
    %19 = vector.shape_cast %18 : vector<128xf32> to vector<128x1xf32>
    %cst_16 = arith.constant 1.000000e-24 : f32
    %20 = vector.broadcast %cst_16 : f32 to vector<128x1xf32>
    %21 = arith.maximumf %19, %20 : vector<128x1xf32>
    %22 = math.rsqrt %21 : vector<128x1xf32>
    %23 = vector.broadcast %22 : vector<128x1xf32> to vector<128x128xf32>
    %24 = arith.mulf %16, %23 : vector<128x128xf32>
    %cst_17 = arith.constant 0.000000e+00 : f32
    %25 = vector.broadcast %cst_17 : f32 to vector<128x128xf32>
    %26 = arith.maximumf %24, %25 : vector<128x128xf32>
    %27 = arith.addf %26, %5 : vector<128x128xf32>
    %c1 = arith.constant 1 : index
    %c0_18 = arith.constant 0 : index
    %c0_19 = arith.constant 0 : index
    %28 = vector.load %arg4[%c1, %c0_18, %c0_19] : memref<3x128x128xbf16, #tpu.memory_space<vmem>>, vector<1x128x128xbf16>
    %29 = vector.shape_cast %28 : vector<1x128x128xbf16> to vector<128x128xbf16>
    %c1_20 = arith.constant 1 : index
    %c0_21 = arith.constant 0 : index
    %c0_22 = arith.constant 0 : index
    %30 = vector.load %arg5[%c1_20, %c0_21, %c0_22] : memref<3x1x128xf32, #tpu.memory_space<vmem>>, vector<1x1x128xf32>
    %31 = vector.shape_cast %30 : vector<1x1x128xf32> to vector<1x128xf32>
    %32 = arith.truncf %27 : vector<128x128xf32> to vector<128x128xbf16>
    %cst_23 = arith.constant dense<0.000000e+00> : vector<128x128xf32>
    %33 = tpu.matmul %32, %29, %cst_23 {dimension_numbers = #tpu.dot_dimension_numbers<[1], [0], [0], [1], [0, 0, 1, 1], [], []>} : vector<128x128xbf16>, vector<128x128xbf16>, vector<128x128xf32> -> vector<128x128xf32>
    %34 = vector.broadcast %31 : vector<1x128xf32> to vector<128x128xf32>
    %35 = arith.addf %33, %34 : vector<128x128xf32>
    %36 = arith.truncf %35 : vector<128x128xf32> to vector<128x128xbf16>
    %cst_24 = arith.constant dense<0.000000e+00> : vector<128x128xf32>
    %37 = tpu.matmul %6, %36, %cst_24 {dimension_numbers = #tpu.dot_dimension_numbers<[1], [0], [0], [1], [0, 0, 1, 1], [], []>} : vector<128x128xbf16>, vector<128x128xbf16>, vector<128x128xf32> -> vector<128x128xf32>
    %38 = arith.mulf %37, %37 : vector<128x128xf32>
    %cst_25 = arith.constant dense<0.000000e+00> : vector<128xf32>
    %39 = vector.multi_reduction <add>, %38, %cst_25 [1] : vector<128x128xf32> to vector<128xf32>
    %40 = vector.shape_cast %39 : vector<128xf32> to vector<128x1xf32>
    %cst_26 = arith.constant 1.000000e-24 : f32
    %41 = vector.broadcast %cst_26 : f32 to vector<128x1xf32>
    %42 = arith.maximumf %40, %41 : vector<128x1xf32>
    %43 = math.rsqrt %42 : vector<128x1xf32>
    %44 = vector.broadcast %43 : vector<128x1xf32> to vector<128x128xf32>
    %45 = arith.mulf %37, %44 : vector<128x128xf32>
    %cst_27 = arith.constant 0.000000e+00 : f32
    %46 = vector.broadcast %cst_27 : f32 to vector<128x128xf32>
    %47 = arith.maximumf %45, %46 : vector<128x128xf32>
    %48 = arith.addf %47, %27 : vector<128x128xf32>
    %c2 = arith.constant 2 : index
    %c0_28 = arith.constant 0 : index
    %c0_29 = arith.constant 0 : index
    %49 = vector.load %arg4[%c2, %c0_28, %c0_29] : memref<3x128x128xbf16, #tpu.memory_space<vmem>>, vector<1x128x128xbf16>
    %50 = vector.shape_cast %49 : vector<1x128x128xbf16> to vector<128x128xbf16>
    %c2_30 = arith.constant 2 : index
    %c0_31 = arith.constant 0 : index
    %c0_32 = arith.constant 0 : index
    %51 = vector.load %arg5[%c2_30, %c0_31, %c0_32] : memref<3x1x128xf32, #tpu.memory_space<vmem>>, vector<1x1x128xf32>
    %52 = vector.shape_cast %51 : vector<1x1x128xf32> to vector<1x128xf32>
    %53 = arith.truncf %48 : vector<128x128xf32> to vector<128x128xbf16>
    %cst_33 = arith.constant dense<0.000000e+00> : vector<128x128xf32>
    %54 = tpu.matmul %53, %50, %cst_33 {dimension_numbers = #tpu.dot_dimension_numbers<[1], [0], [0], [1], [0, 0, 1, 1], [], []>} : vector<128x128xbf16>, vector<128x128xbf16>, vector<128x128xf32> -> vector<128x128xf32>
    %55 = vector.broadcast %52 : vector<1x128xf32> to vector<128x128xf32>
    %56 = arith.addf %54, %55 : vector<128x128xf32>
    %57 = arith.truncf %56 : vector<128x128xf32> to vector<128x128xbf16>
    %cst_34 = arith.constant dense<0.000000e+00> : vector<128x128xf32>
    %58 = tpu.matmul %6, %57, %cst_34 {dimension_numbers = #tpu.dot_dimension_numbers<[1], [0], [0], [1], [0, 0, 1, 1], [], []>} : vector<128x128xbf16>, vector<128x128xbf16>, vector<128x128xf32> -> vector<128x128xf32>
    %59 = arith.mulf %58, %58 : vector<128x128xf32>
    %cst_35 = arith.constant dense<0.000000e+00> : vector<128xf32>
    %60 = vector.multi_reduction <add>, %59, %cst_35 [1] : vector<128x128xf32> to vector<128xf32>
    %61 = vector.shape_cast %60 : vector<128xf32> to vector<128x1xf32>
    %cst_36 = arith.constant 1.000000e-24 : f32
    %62 = vector.broadcast %cst_36 : f32 to vector<128x1xf32>
    %63 = arith.maximumf %61, %62 : vector<128x1xf32>
    %64 = math.rsqrt %63 : vector<128x1xf32>
    %65 = vector.broadcast %64 : vector<128x1xf32> to vector<128x128xf32>
    %66 = arith.mulf %58, %65 : vector<128x128xf32>
    %cst_37 = arith.constant 0.000000e+00 : f32
    %67 = vector.broadcast %cst_37 : f32 to vector<128x128xf32>
    %68 = arith.maximumf %66, %67 : vector<128x128xf32>
    %c0_38 = arith.constant 0 : index
    %c0_39 = arith.constant 0 : index
    %69 = vector.load %arg6[%c0_38, %c0_39] : memref<128x128xf32, #tpu.memory_space<vmem>>, vector<128x128xf32>
    tpu.vector_store %arg6[%c0_38, %c0_39], %68 {strides = array<i32>} : memref<128x128xf32, #tpu.memory_space<vmem>>, vector<128x128xf32>,
    return
  }
}

</mosaic_0001>

<bundles_post_ra>
// kernel: gcn_forward_pallas.1
= control target key start
LH: loop header
LB: loop body
LE: loop exit
PB: predicated region body
PF: predicated region fallthrough
CT: control target
= control target key end

     0   :  { %11 = vsyncpa [#allocation3], 0  ;;  %s2788_s0 = inlined_call_operand.hbm [shape: bf16[128,128], index: 0, kind: input, shape index: {}]   ;;  %s2789_s1 = inlined_call_operand.hbm [shape: bf16[128,128], index: 1, kind: input, shape index: {}]   ;;  %s2790_s2 = inlined_call_operand.hbm [shape: bf16[128,128], index: 2, kind: input, shape index: {}]   ;;  %s2791_s3 = inlined_call_operand.vmem [shape: f32[1,128], index: 3, kind: input, shape index: {}]   ;;  %s2792_s4 = inlined_call_operand.hbm [shape: bf16[3,128,128], index: 4, kind: input, shape index: {}]   ;;  %s2793_s5 = inlined_call_operand.vmem [shape: f32[3,1,128], index: 5, kind: input, shape index: {}]   ;;  %s2794_s6 = inlined_call_operand.vmem [shape: f32[128,128], index: 6, kind: output, shape index: {}]  }
   0x1   :  { %12 = vsyncpa [#allocation5], 0 }
   0x2   :  { %13 = vsyncpa [#allocation8], 0  ;;  %s2261_s21 = smov [#allocation4]   ;;  %s2262_s23 = smov [#allocation2]  }
   0x3   :  { %s31_s22 = sshll.u32 %s2261_s21, 4  ;;  %s19_s24 = sshll.u32 %s2262_s23, 4  ;;  %s32_s22 = int_to_ptr.vmem [resolvable:$true] %s31_s22  ;;  %s20_s24 = int_to_ptr.vmem [resolvable:$true] %s19_s24 }
   0x4   :  { %s2183_s25 = scalar_lea.vmem %s32_s22, 1024  ;;  %p2188_p1 = scmp.lt.s32.totalorder %s32_s22, %s32_s22 }
   0x5   :  { %p2184_p0 = scmp.ne.s32.totalorder %s32_s22, %s2183_s25  ;;  %p2189_p2 = scmp.lt.s32.totalorder %s2183_s25, %s2183_s25 }
   0x7   :  { %p2190_p3 = por %p2189_p2, %p2188_p1 }
   0x9   :  { %p2191_p4 = pnand %p2190_p3, %p2184_p0 }
   0xb   :  { %2194 = shalt.err (!%p2191_p4)
}
   0xc   :  { %s2263_s26 = smov 64   ;;  %s2264_s27 = smov 4  }
   0xd   :  { %37 = dma.hbm_to_vmem [thread:$0]  %s2789_s1, 1024, %s32_s22, [#allocation5], %s2263_s26, %s2263_s26, %s2264_s27  }
   0xe   :  { %s2203_s30 = scalar_lea.vmem %s20_s24, 1024  ;;  %p2208_p6 = scmp.lt.s32.totalorder %s20_s24, %s20_s24 }
   0xf   :  { %p2204_p5 = scmp.ne.s32.totalorder %s20_s24, %s2203_s30  ;;  %p2209_p7 = scmp.lt.s32.totalorder %s2203_s30, %s2203_s30 }
  0x11   :  { %p2210_p8 = por %p2209_p7, %p2208_p6 }
  0x13   :  { %p2211_p9 = pnand %p2210_p8, %p2204_p5 }
  0x15   :  { %2214 = shalt.err (!%p2211_p9)
}
  0x16   :  { %25 = dma.hbm_to_vmem [thread:$0]  %s2788_s0, 1024, %s20_s24, [#allocation3], %s2263_s26, %s2263_s26, %s2264_s27  }
  0x17   :  { %s2265_s9 = smov [#allocation6]   ;;  %s2266_s11 = smov [#allocation7]  }
  0x18   :  { %s43_s10 = sshll.u32 %s2265_s9, 4  ;;  %s57_s12 = sshll.u32 %s2266_s11, 4  ;;  %s44_s10 = int_to_ptr.vmem [resolvable:$true] %s43_s10  ;;  %s58_s12 = int_to_ptr.vmem [resolvable:$true] %s57_s12 }
  0x19   :  { %s2223_s1 = scalar_lea.vmem %s44_s10, 1024  ;;  %p2228_p11 = scmp.lt.s32.totalorder %s44_s10, %s44_s10 }
  0x1a   :  { %p2224_p10 = scmp.ne.s32.totalorder %s44_s10, %s2223_s1  ;;  %p2229_p12 = scmp.lt.s32.totalorder %s2223_s1, %s2223_s1 }
  0x1c   :  { %p2230_p13 = por %p2229_p12, %p2228_p11 }
  0x1e   :  { %p2231_p0 = pnand %p2230_p13, %p2224_p10 }
  0x20   :  { %2234 = shalt.err (!%p2231_p0)
}
  0x21   :  { %49 = dma.hbm_to_vmem [thread:$0]  %s2790_s2, 1024, %s44_s10, [#allocation5], %s2263_s26, %s2263_s26, %s2264_s27  }
  0x22   :  { %s2243_s0 = scalar_lea.vmem %s58_s12, 3072  ;;  %p2248_p2 = scmp.lt.s32.totalorder %s58_s12, %s58_s12 }
  0x23   :  { %p2244_p1 = scmp.ne.s32.totalorder %s58_s12, %s2243_s0  ;;  %p2249_p3 = scmp.lt.s32.totalorder %s2243_s0, %s2243_s0 }
  0x25   :  { %p2250_p4 = por %p2249_p3, %p2248_p2 }
  0x27   :  { %p2251_p5 = pnand %p2250_p4, %p2244_p1 }
  0x29   :  { %2254 = shalt.err (!%p2251_p5)
}
  0x2a   :  { %63 = dma.hbm_to_vmem [thread:$0]  %s2792_s4, 3072, %s58_s12, [#allocation8], %s2263_s26, %s2263_s26, %s2264_s27  }
  0x2b   :  { %2255 = dma.done.wait [#allocation3], 1024  }
  0x2c   :  { %2256 = vsyncadd [#allocation3], 4294966272 }
  0x2d   :  { %2257 = dma.done.wait [#allocation5], 2048  }
  0x2e   :  { %2258 = vsyncadd [#allocation5], 4294965248 }
  0x2f   :  { %2259 = dma.done.wait [#allocation8], 3072  }
  0x30   :  { %2260 = vsyncadd [#allocation8], 4294964224  ;;  %v2025_v0 = vld [vmem:[#allocation6 + $0x38] sm:$0xff]   ;;  %v2026_v1 = vld [vmem:[#allocation6 + $0x30] sm:$0xff]  }
  0x31   :  { %1779 = vmatprep.subr.bf16.mxu0 %v2025_v0  ;;  %v2027_v2 = vld [vmem:[#allocation6 + $0x28] sm:$0xff]   ;;  %v2028_v3 = vld [vmem:[#allocation6 + $0x20] sm:$0xff]   ;;  %v2029_v5 = vld [vmem:[#allocation6 + $0x18] sm:$0xff]  }
  0x32   :  { %1780 = vmatpush3.bf16.msra.mxu0 %v2025_v0  ;;  %v2033_v4 = vld [vmem:[#allocation2] sm:$0xff]   ;;  %v2030_v6 = vld [vmem:[#allocation6 + $0x10] sm:$0xff]   ;;  %v2041_v7 = vld [vmem:[#allocation7 + $0x38] sm:$0xff]  }
  0x33   :  { %1781 = vmatprep.subr.bf16.mxu0 %v2026_v1  ;;  %1795 = vmatprep.mubr.bf16.mxu0 %v2033_v4  ;;  %v2042_v8 = vld [vmem:[#allocation7 + $0x30] sm:$0xff]   ;;  %v2031_v9 = vld [vmem:[#allocation6 + $0x8] sm:$0xff]   ;;  %v2032_v11 = vld [vmem:[#allocation6] sm:$0xff]  }
  0x34   :  { %1811 = vmatprep.subr.bf16.mxu1 %v2041_v7  ;;  %v2043_v10 = vld [vmem:[#allocation7 + $0x28] sm:$0xff]   ;;  %v2044_v12 = vld [vmem:[#allocation7 + $0x20] sm:$0xff]   ;;  %v2045_v13 = vld [vmem:[#allocation7 + $0x18] sm:$0xff]  }
  0x35   :  { %1812 = vmatpush3.bf16.msra.mxu1 %v2041_v7  ;;  %v2034_v14 = vld [vmem:[#allocation2 + $0x8] sm:$0xff]   ;;  %v2035_v15 = vld [vmem:[#allocation2 + $0x10] sm:$0xff]   ;;  %v2036_v16 = vld [vmem:[#allocation2 + $0x18] sm:$0xff]  }
  0x36   :  { %1782 = vmatpush3.bf16.msra.mxu0 %v2026_v1  ;;  %1813 = vmatprep.subr.bf16.mxu1 %v2042_v8  ;;  %v2037_v17 = vld [vmem:[#allocation2 + $0x20] sm:$0xff]   ;;  %v2038_v18 = vld [vmem:[#allocation2 + $0x28] sm:$0xff]   ;;  %v2039_v19 = vld [vmem:[#allocation2 + $0x30] sm:$0xff]  }
  0x37   :  { %1783 = vmatprep.subr.bf16.mxu0 %v2027_v2  ;;  %v2040_v20 = vld [vmem:[#allocation2 + $0x38] sm:$0xff]   ;;  %v2046_v21 = vld [vmem:[#allocation7 + $0x10] sm:$0xff]   ;;  %v2047_v22 = vld [vmem:[#allocation7 + $0x8] sm:$0xff]  }
  0x38   :  { %v2048_v23 = vld [vmem:[#allocation7] sm:$0xff]  }
  0x39   :  { %1814 = vmatpush3.bf16.msra.mxu1 %v2042_v8  ;;  %v1613_v27 = vld [vmem:[%s2791_s3] ss:$0 sm:$0xff] }
  0x3a   :  { %1784 = vmatpush3.bf16.msra.mxu0 %v2027_v2  ;;  %1815 = vmatprep.subr.bf16.mxu1 %v2043_v10  ;;  %v2377_v1 = vld [vmem:[#allocation4] sm:$0xff]  }
  0x3b   :  { %1785 = vmatprep.subr.bf16.mxu0 %v2028_v3 }
  0x3d   :  { %1816 = vmatpush3.bf16.msra.mxu1 %v2043_v10 }
  0x3e   :  { %1786 = vmatpush3.bf16.msra.mxu0 %v2028_v3  ;;  %1817 = vmatprep.subr.bf16.mxu1 %v2044_v12 }
  0x3f   :  { %1787 = vmatprep.subr.bf16.mxu0 %v2029_v5 }
  0x41   :  { %1818 = vmatpush3.bf16.msra.mxu1 %v2044_v12 }
  0x42   :  { %1788 = vmatpush3.bf16.msra.mxu0 %v2029_v5  ;;  %1819 = vmatprep.subr.bf16.mxu1 %v2045_v13 }
  0x43   :  { %1789 = vmatprep.subr.bf16.mxu0 %v2030_v6 }
  0x45   :  { %1820 = vmatpush3.bf16.msra.mxu1 %v2045_v13 }
  0x46   :  { %1790 = vmatpush3.bf16.msra.mxu0 %v2030_v6  ;;  %1821 = vmatprep.subr.bf16.mxu1 %v2046_v21 }
  0x47   :  { %1791 = vmatprep.subr.bf16.mxu0 %v2031_v9 }
  0x49   :  { %1822 = vmatpush3.bf16.msra.mxu1 %v2046_v21 }
  0x4a   :  { %1792 = vmatpush3.bf16.msra.mxu0 %v2031_v9  ;;  %1823 = vmatprep.subr.bf16.mxu1 %v2047_v22 }
  0x4b   :  { %1793 = vmatprep.subr.bf16.mxu0 %v2032_v11 }
  0x4d   :  { %1824 = vmatpush3.bf16.msra.mxu1 %v2047_v22 }
  0x4e   :  { %1794 = vmatpush3.bf16.msra.mxu0 %v2032_v11  ;;  %1825 = vmatprep.subr.bf16.mxu1 %v2048_v23 }
  0x51   :  { %1796 = vmatmul.mubr.bf16.vlgmr.msra.gmra.mxu0 %v2034_v14  ;;  %1826 = vmatpush3.bf16.msra.mxu1 %v2048_v23 }
  0x52   :  { %1799 = vmatprep.mubr.bf16.mxu0 %v2035_v15 }
  0x59   :  { %1800 = vmatmul.mubr.bf16.gmra.mxu0 %v2036_v16  ;;  %v1630_v16 = vld [vmem:[%s2793_s5] ss:$0 sm:$0xff] }
  0x5a   :  { %1803 = vmatprep.mubr.bf16.mxu0 %v2037_v17 }
  0x61   :  { %1804 = vmatmul.mubr.bf16.gmra.mxu0 %v2038_v18 }
  0x62   :  { %1807 = vmatprep.mubr.bf16.mxu0 %v2039_v19 }
  0x69   :  { %1808 = vmatmul.mubr.bf16.gmra.mxu0 %v2040_v20 }
  0x6a   :  { %1859 = vmatprep.mubr.bf16.mxu0 %v2377_v1 }
 0x111   :  { %v1797_v24 = vpop.f32.mrf.mxu0 }
 0x112   :  { %v2335_v32 = vadd.f32 %v1797_v24, %v1613_v27 }
 0x113   :  { %v248_v25 = vpop.f32.mrf.mxu0 }
 0x114   :  { %v2331_v30 = vadd.f32 %v1613_v27, %v248_v25 }
 0x115   :  { %v1798_v26 = vpop.f32.mrf.mxu0 }
 0x116   :  { %v2329_v28 = vadd.f32 %v1798_v26, %v1613_v27 }
 0x117   :  { %v251_v29 = vpop.f32.mrf.mxu0 }
 0x118   :  { %v2333_v31 = vadd.f32 %v1613_v27, %v251_v29  ;;  %v345_v35 = vpack.c.bf16 %v2329_v28, %v2335_v32 }
 0x119   :  { %v1801_v33 = vpop.f32.mrf.mxu0 }
 0x11a   :  { %v344_v34 = vpack.c.bf16 %v2333_v31, %v2331_v30  ;;  %v2347_v42 = vadd.f32 %v1801_v33, %v1613_v27 }
 0x11b   :  { %v264_v36 = vpop.f32.mrf.mxu0 }
 0x11c   :  { %1827 = vmatprep.mubr.bf16.mxu1 %v344_v34  ;;  %v2343_v40 = vadd.f32 %v1613_v27, %v264_v36 }
 0x11d   :  { %v1802_v37 = vpop.f32.mrf.mxu0  ;;  %1828 = vmatmul.mubr.bf16.vlgmr.msra.gmra.mxu1 %v345_v35 }
 0x11e   :  { %v2341_v38 = vadd.f32 %v1802_v37, %v1613_v27 }
 0x11f   :  { %v267_v39 = vpop.f32.mrf.mxu0 }
 0x120   :  { %v2345_v41 = vadd.f32 %v1613_v27, %v267_v39  ;;  %v347_v45 = vpack.c.bf16 %v2341_v38, %v2347_v42 }
 0x121   :  { %v1805_v43 = vpop.f32.mrf.mxu0 }
 0x122   :  { %v346_v44 = vpack.c.bf16 %v2345_v41, %v2343_v40  ;;  %v2359_v52 = vadd.f32 %v1805_v43, %v1613_v27 }
 0x123   :  { %v280_v46 = vpop.f32.mrf.mxu0 }
 0x124   :  { %1831 = vmatprep.mubr.bf16.mxu1 %v346_v44  ;;  %v2355_v50 = vadd.f32 %v1613_v27, %v280_v46 }
 0x125   :  { %v1806_v47 = vpop.f32.mrf.mxu0  ;;  %1832 = vmatmul.mubr.bf16.gmra.mxu1 %v347_v45 }
 0x126   :  { %v2353_v48 = vadd.f32 %v1806_v47, %v1613_v27 }
 0x127   :  { %v283_v49 = vpop.f32.mrf.mxu0 }
 0x128   :  { %v2357_v51 = vadd.f32 %v1613_v27, %v283_v49  ;;  %v349_v55 = vpack.c.bf16 %v2353_v48, %v2359_v52 }
 0x129   :  { %v1809_v53 = vpop.f32.mrf.mxu0 }
 0x12a   :  { %v348_v54 = vpack.c.bf16 %v2357_v51, %v2355_v50  ;;  %v2371_v62 = vadd.f32 %v1809_v53, %v1613_v27 }
 0x12b   :  { %v296_v56 = vpop.f32.mrf.mxu0 }
 0x12c   :  { %1835 = vmatprep.mubr.bf16.mxu1 %v348_v54  ;;  %v2367_v60 = vadd.f32 %v1613_v27, %v296_v56  ;;  %v2385_v56 = vld [vmem:[#allocation4 + $0x10] sm:$0xff]  }
 0x12d   :  { %v1810_v57 = vpop.f32.mrf.mxu0  ;;  %1836 = vmatmul.mubr.bf16.gmra.mxu1 %v349_v55  ;;  %v2383_v55 = vld [vmem:[#allocation4 + $0x8] sm:$0xff]  }
 0x12e   :  { %v2365_v58 = vadd.f32 %v1810_v57, %v1613_v27  ;;  %v2389_v57 = vld [vmem:[#allocation4 + $0x18] sm:$0xff]  }
 0x12f   :  { %v299_v59 = vpop.f32.mrf.mxu0 }
 0x130   :  { %v2369_v61 = vadd.f32 %v1613_v27, %v299_v59  ;;  %v351_v0 = vpack.c.bf16 %v2365_v58, %v2371_v62  ;;  %v2391_v59 = vld [vmem:[#allocation4 + $0x20] sm:$0xff]  }
 0x132   :  { %v350_v63 = vpack.c.bf16 %v2369_v61, %v2367_v60 }
 0x134   :  { %1839 = vmatprep.mubr.bf16.mxu1 %v350_v63  ;;  %v2395_v63 = vld [vmem:[#allocation4 + $0x28] sm:$0xff]  }
 0x135   :  { %1840 = vmatmul.mubr.bf16.gmra.mxu1 %v351_v0  ;;  %v2397_v0 = vld [vmem:[#allocation4 + $0x30] sm:$0xff]  }
 0x1dd   :  { %v1829_v2 = vpop.f32.mrf.mxu1 }
 0x1de   :  { %v449_v46 = vadd.f32 %v1829_v2, %v1630_v16  ;;  %v2401_v2 = vld [vmem:[#allocation4 + $0x38] sm:$0xff]  }
 0x1df   :  { %v440_v3 = vpop.f32.mrf.mxu1 }
 0x1e0   :  { %v441_v53 = vadd.f32 %v1630_v16, %v440_v3  ;;  %v2057_v3 = vld [vmem:[#allocation7 + $0x78] sm:$0xff]  }
 0x1e1   :  { %v1830_v4 = vpop.f32.mrf.mxu1  ;;  %1875 = vmatprep.subr.bf16.mxu1 %v2057_v3 }
 0x1e2   :  { %v452_v44 = vadd.f32 %v1830_v4, %v1630_v16  ;;  %1876 = vmatpush3.bf16.msra.mxu1 %v2057_v3 }
 0x1e3   :  { %v443_v5 = vpop.f32.mrf.mxu1 }
 0x1e4   :  { %v504_v47 = vpack.c.bf16 %v452_v44, %v449_v46  ;;  %v444_v49 = vadd.f32 %v1630_v16, %v443_v5 }
 0x1e5   :  { %v1833_v6 = vpop.f32.mrf.mxu1 }
 0x1e6   :  { %v465_v36 = vadd.f32 %v1833_v6, %v1630_v16  ;;  %v503_v54 = vpack.c.bf16 %v444_v49, %v441_v53  ;;  %v2063_v53 = vld [vmem:[#allocation7 + $0x48] sm:$0xff]  }
 0x1e7   :  { %v456_v7 = vpop.f32.mrf.mxu1 }
 0x1e8   :  { %v457_v43 = vadd.f32 %v1630_v16, %v456_v7 }
 0x1e9   :  { %v1834_v8 = vpop.f32.mrf.mxu1 }
 0x1ea   :  { %v468_v34 = vadd.f32 %v1834_v8, %v1630_v16 }
 0x1eb   :  { %v459_v9 = vpop.f32.mrf.mxu1 }
 0x1ec   :  { %v506_v37 = vpack.c.bf16 %v468_v34, %v465_v36  ;;  %v460_v39 = vadd.f32 %v1630_v16, %v459_v9 }
 0x1ed   :  { %v1837_v10 = vpop.f32.mrf.mxu1 }
 0x1ee   :  { %v481_v26 = vadd.f32 %v1837_v10, %v1630_v16  ;;  %v505_v45 = vpack.c.bf16 %v460_v39, %v457_v43  ;;  %v2061_v39 = vld [vmem:[#allocation7 + $0x58] sm:$0xff]  }
 0x1ef   :  { %v472_v11 = vpop.f32.mrf.mxu1 }
 0x1f0   :  { %v473_v33 = vadd.f32 %v1630_v16, %v472_v11 }
 0x1f1   :  { %v1838_v12 = vpop.f32.mrf.mxu1 }
 0x1f2   :  { %v484_v24 = vadd.f32 %v1838_v12, %v1630_v16 }
 0x1f3   :  { %v475_v13 = vpop.f32.mrf.mxu1 }
 0x1f4   :  { %v508_v27 = vpack.c.bf16 %v484_v24, %v481_v26  ;;  %v476_v29 = vadd.f32 %v1630_v16, %v475_v13 }
 0x1f5   :  { %v1841_v14 = vpop.f32.mrf.mxu1 }
 0x1f6   :  { %v497_v18 = vadd.f32 %v1841_v14, %v1630_v16  ;;  %v507_v35 = vpack.c.bf16 %v476_v29, %v473_v33 }
 0x1f7   :  { %v488_v15 = vpop.f32.mrf.mxu1 }
 0x1f8   :  { %v489_v21 = vadd.f32 %v1630_v16, %v488_v15 }
 0x1f9   :  { %v1842_v17 = vpop.f32.mrf.mxu1 }
 0x1fa   :  { %v500_v19 = vadd.f32 %v1842_v17, %v1630_v16  ;;  %v2058_v17 = vld [vmem:[#allocation7 + $0x70] sm:$0xff]  }
 0x1fb   :  { %v491_v20 = vpop.f32.mrf.mxu1  ;;  %1877 = vmatprep.subr.bf16.mxu1 %v2058_v17 }
 0x1fc   :  { %v510_v22 = vpack.c.bf16 %v500_v19, %v497_v18  ;;  %v492_v23 = vadd.f32 %v1630_v16, %v491_v20  ;;  %1878 = vmatpush3.bf16.msra.mxu1 %v2058_v17 }
 0x1fe   :  { %v509_v25 = vpack.c.bf16 %v492_v23, %v489_v21  ;;  %1843 = vmatprep.subr.bf16.mxu0 %v510_v22 }
 0x1ff   :  { %1844 = vmatpush3.bf16.msra.mxu0 %v510_v22  ;;  %v2059_v22 = vld [vmem:[#allocation7 + $0x68] sm:$0xff]  }
 0x200   :  { %1845 = vmatprep.subr.bf16.mxu0 %v509_v25  ;;  %1879 = vmatprep.subr.bf16.mxu1 %v2059_v22 }
 0x201   :  { %1880 = vmatpush3.bf16.msra.mxu1 %v2059_v22 }
 0x203   :  { %1846 = vmatpush3.bf16.msra.mxu0 %v509_v25 }
 0x204   :  { %1847 = vmatprep.subr.bf16.mxu0 %v508_v27 }
 0x207   :  { %1848 = vmatpush3.bf16.msra.mxu0 %v508_v27  ;;  %v2060_v27 = vld [vmem:[#allocation7 + $0x60] sm:$0xff]  }
 0x208   :  { %1849 = vmatprep.subr.bf16.mxu0 %v507_v35  ;;  %1881 = vmatprep.subr.bf16.mxu1 %v2060_v27 }
 0x209   :  { %1882 = vmatpush3.bf16.msra.mxu1 %v2060_v27 }
 0x20a   :  { %1883 = vmatprep.subr.bf16.mxu1 %v2061_v39 }
 0x20b   :  { %1850 = vmatpush3.bf16.msra.mxu0 %v507_v35 }
 0x20c   :  { %1851 = vmatprep.subr.bf16.mxu0 %v506_v37 }
 0x20d   :  { %1884 = vmatpush3.bf16.msra.mxu1 %v2061_v39 }
 0x20f   :  { %1852 = vmatpush3.bf16.msra.mxu0 %v506_v37 }
 0x210   :  { %1853 = vmatprep.subr.bf16.mxu0 %v505_v45 }
 0x213   :  { %1854 = vmatpush3.bf16.msra.mxu0 %v505_v45 }
 0x214   :  { %1855 = vmatprep.subr.bf16.mxu0 %v504_v47 }
 0x217   :  { %1856 = vmatpush3.bf16.msra.mxu0 %v504_v47  ;;  %v2062_v47 = vld [vmem:[#allocation7 + $0x50] sm:$0xff]  }
 0x218   :  { %1857 = vmatprep.subr.bf16.mxu0 %v503_v54  ;;  %1885 = vmatprep.subr.bf16.mxu1 %v2062_v47 }
 0x219   :  { %1886 = vmatpush3.bf16.msra.mxu1 %v2062_v47 }
 0x21a   :  { %1887 = vmatprep.subr.bf16.mxu1 %v2063_v53 }
 0x21b   :  { %1858 = vmatpush3.bf16.msra.mxu0 %v503_v54  ;;  %v2064_v54 = vld [vmem:[#allocation7 + $0x40] sm:$0xff]  }
 0x21d   :  { %1888 = vmatpush3.bf16.msra.mxu1 %v2063_v53 }
 0x21e   :  { %1860 = vmatmul.mubr.bf16.vlgmr.msra.gmra.mxu0 %v2383_v55  ;;  %1889 = vmatprep.subr.bf16.mxu1 %v2064_v54 }
 0x21f   :  { %1863 = vmatprep.mubr.bf16.mxu0 %v2385_v56 }
 0x221   :  { %1890 = vmatpush3.bf16.msra.mxu1 %v2064_v54 }
 0x226   :  { %1864 = vmatmul.mubr.bf16.gmra.mxu0 %v2389_v57 }
 0x227   :  { %1867 = vmatprep.mubr.bf16.mxu0 %v2391_v59 }
 0x22e   :  { %1868 = vmatmul.mubr.bf16.gmra.mxu0 %v2395_v63 }
 0x22f   :  { %1871 = vmatprep.mubr.bf16.mxu0 %v2397_v0 }
 0x236   :  { %1872 = vmatmul.mubr.bf16.gmra.mxu0 %v2401_v2 }
 0x237   :  { %1923 = vmatprep.mubr.bf16.mxu0 %v2377_v1 }
 0x2de   :  { %v2405_v4 = vpop.f32.mrf.mxu0 }
 0x2df   :  { %v658_v5 = vmul.f32 %v2405_v4, %v2405_v4 }
 0x2e0   :  { %v2409_v6 = vpop.f32.mrf.mxu0 }
 0x2e1   :  { %676 = vadd.xlane.f32.xlu1 %v658_v5  ;;  %v656_v7 = vmul.f32 %v2409_v6, %v2409_v6 }
 0x2e2   :  { %v2413_v8 = vpop.f32.mrf.mxu0 }
 0x2e3   :  { %672 = vadd.xlane.f32.xlu0 %v656_v7  ;;  %v659_v9 = vmul.f32 %v2413_v8, %v2413_v8 }
 0x2e4   :  { %v2417_v10 = vpop.f32.mrf.mxu0 }
 0x2e5   :  { %678 = vadd.xlane.f32.xlu1 %v659_v9  ;;  %v657_v11 = vmul.f32 %v2417_v10, %v2417_v10 }
 0x2e6   :  { %v2421_v12 = vpop.f32.mrf.mxu0 }
 0x2e7   :  { %674 = vadd.xlane.f32.xlu0 %v657_v11  ;;  %v662_v18 = vmul.f32 %v2421_v12, %v2421_v12 }
 0x2e8   :  { %v2423_v13 = vpop.f32.mrf.mxu0 }
 0x2e9   :  { %v660_v14 = vmul.f32 %v2423_v13, %v2423_v13 }
 0x2ea   :  { %v2427_v15 = vpop.f32.mrf.mxu0 }
 0x2eb   :  { %680 = vadd.xlane.f32.xlu0 %v660_v14  ;;  %v663_v23 = vmul.f32 %v2427_v15, %v2427_v15 }
 0x2ec   :  { %v2429_v16 = vpop.f32.mrf.mxu0 }
 0x2ed   :  { %v661_v19 = vmul.f32 %v2429_v16, %v2429_v16 }
 0x2ee   :  { %v2435_v20 = vpop.f32.mrf.mxu0 }
 0x2ef   :  { %684 = vadd.xlane.f32.xlu0 %v662_v18  ;;  %682 = vadd.xlane.f32.xlu1 %v661_v19  ;;  %v666_v29 = vmul.f32 %v2435_v20, %v2435_v20 }
 0x2f0   :  { %v2437_v21 = vpop.f32.mrf.mxu0 }
 0x2f1   :  { %v664_v24 = vmul.f32 %v2437_v21, %v2437_v21 }
 0x2f2   :  { %v2443_v25 = vpop.f32.mrf.mxu0 }
 0x2f3   :  { %686 = vadd.xlane.f32.xlu1 %v663_v23  ;;  %688 = vadd.xlane.f32.xlu0 %v664_v24  ;;  %v667_v36 = vmul.f32 %v2443_v25, %v2443_v25 }
 0x2f4   :  { %v2445_v26 = vpop.f32.mrf.mxu0 }
 0x2f5   :  { %v665_v33 = vmul.f32 %v2445_v26, %v2445_v26 }
 0x2f6   :  { %v2451_v34 = vpop.f32.mrf.mxu0 }
 0x2f7   :  { %692 = vadd.xlane.f32.xlu0 %v666_v29  ;;  %690 = vadd.xlane.f32.xlu1 %v665_v33  ;;  %v670_v45 = vmul.f32 %v2451_v34, %v2451_v34 }
 0x2f8   :  { %v2453_v35 = vpop.f32.mrf.mxu0 }
 0x2f9   :  { %v668_v37 = vmul.f32 %v2453_v35, %v2453_v35 }
 0x2fa   :  { %v2459_v43 = vpop.f32.mrf.mxu0 }
 0x2fb   :  { %694 = vadd.xlane.f32.xlu1 %v667_v36  ;;  %696 = vadd.xlane.f32.xlu0 %v668_v37  ;;  %v671_v49 = vmul.f32 %v2459_v43, %v2459_v43 }
 0x2fc   :  { %v2461_v44 = vpop.f32.mrf.mxu0 }
 0x2fd   :  { %v669_v46 = vmul.f32 %v2461_v44, %v2461_v44 }
 0x2ff   :  { %700 = vadd.xlane.f32.xlu0 %v670_v45  ;;  %698 = vadd.xlane.f32.xlu1 %v669_v46 }
 0x303   :  { %702 = vadd.xlane.f32.xlu1 %v671_v49 }
 0x36a   :  { %v677_v3 = vpop.xlane.xlu1 %676 }
 0x36b   :  { %v706_v5 = vmax.f32 %v677_v3, 1e-24 }
 0x36c   :  { %v673_v7 = vpop.xlane.xlu0 %672 }
 0x36d   :  { %v704_v9 = vmax.f32 %v673_v7, 1e-24  ;;  %2073 = vrsqrt.f32 %v706_v5 }
 0x36e   :  { %v679_v11 = vpop.xlane.xlu1 %678 }
 0x36f   :  { %2075 = vrsqrt.f32 %v704_v9  ;;  %v707_v14 = vmax.f32 %v679_v11, 1e-24 }
 0x370   :  { %v675_v17 = vpop.xlane.xlu0 %674 }
 0x371   :  { %2077 = vrsqrt.f32 %v707_v14  ;;  %v705_v18 = vmax.f32 %v675_v17, 1e-24 }
 0x373   :  { %2079 = vrsqrt.f32 %v705_v18 }
 0x374   :  { %v681_v19 = vpop.xlane.xlu0 %680 }
 0x375   :  { %v708_v22 = vmax.f32 %v681_v19, 1e-24 }
 0x377   :  { %2081 = vrsqrt.f32 %v708_v22 }
 0x378   :  { %v685_v23 = vpop.xlane.xlu0 %684  ;;  %v683_v24 = vpop.xlane.xlu1 %682 }
 0x379   :  { %v710_v27 = vmax.f32 %v685_v23, 1e-24  ;;  %v709_v29 = vmax.f32 %v683_v24, 1e-24 }
 0x37a   :  { %v2074_v33 = vpop.eup %2073 }
 0x37b   :  { %2083 = vrsqrt.f32 %v710_v27  ;;  %v738_v53 = vmul.f32 %v2074_v33, %v2405_v4 }
 0x37c   :  { %v2076_v36 = vpop.eup %2075  ;;  %2085 = vrsqrt.f32 %v709_v29  ;;  %v687_v37 = vpop.xlane.xlu1 %686 }
 0x37d   :  { %v689_v39 = vpop.xlane.xlu0 %688  ;;  %v711_v45 = vmax.f32 %v687_v37, 1e-24  ;;  %v736_v47 = vmul.f32 %v2076_v36, %v2409_v6  ;;  %v754_v19 = vmax.f32 %v738_v53, 0.0 }
 0x37e   :  { %v712_v46 = vmax.f32 %v689_v39, 1e-24  ;;  %v2078_v49 = vpop.eup %2077 }
 0x37f   :  { %v739_v54 = vmul.f32 %v2078_v49, %v2413_v8  ;;  %2087 = vrsqrt.f32 %v711_v45  ;;  %v752_v9 = vmax.f32 %v736_v47, 0.0 }
 0x380   :  { %v2080_v3 = vpop.eup %2079  ;;  %2089 = vrsqrt.f32 %v712_v46  ;;  %v691_v7 = vpop.xlane.xlu1 %690 }
 0x381   :  { %v693_v5 = vpop.xlane.xlu0 %692  ;;  %v755_v11 = vmax.f32 %v739_v54, 0.0  ;;  %v713_v17 = vmax.f32 %v691_v7, 1e-24  ;;  %v737_v18 = vmul.f32 %v2080_v3, %v2417_v10  ;;  %v2477_v29 = vadd.f32 %v752_v9, %v2331_v30 }
 0x382   :  { %v714_v14 = vmax.f32 %v693_v5, 1e-24  ;;  %v2483_v10 = vadd.f32 %v754_v19, %v2335_v32 }
 0x383   :  { %v753_v22 = vmax.f32 %v737_v18, 0.0  ;;  %v2474_v8 = vadd.f32 %v755_v11, %v2329_v28 }
 0x384   :  { %2091 = vrsqrt.f32 %v714_v14  ;;  %v2082_v6 = vpop.eup %2081  ;;  %v695_v23 = vpop.xlane.xlu1 %694 }
 0x385   :  { %2093 = vrsqrt.f32 %v713_v17  ;;  %v697_v4 = vpop.xlane.xlu0 %696  ;;  %v715_v24 = vmax.f32 %v695_v23, 1e-24  ;;  %v2480_v33 = vadd.f32 %v753_v22, %v2333_v31  ;;  %v740_v36 = vmul.f32 %v2082_v6, %v2423_v13 }
 0x386   :  { %v716_v27 = vmax.f32 %v697_v4, 1e-24  ;;  %v804_v30 = vpack.c.bf16 %v2474_v8, %v2483_v10 }
 0x387   :  { %2095 = vrsqrt.f32 %v715_v24  ;;  %v803_v37 = vpack.c.bf16 %v2480_v33, %v2477_v29  ;;  %v756_v49 = vmax.f32 %v740_v36, 0.0 }
 0x388   :  { %v2084_v39 = vpop.eup %2083  ;;  %2097 = vrsqrt.f32 %v716_v27  ;;  %v699_v45 = vpop.xlane.xlu1 %698 }
 0x389   :  { %v701_v28 = vpop.xlane.xlu0 %700  ;;  %v2086_v46 = vpop.eup %2085  ;;  %v717_v31 = vmax.f32 %v699_v45, 1e-24  ;;  %1891 = vmatprep.mubr.bf16.mxu1 %v803_v37  ;;  %v742_v32 = vmul.f32 %v2084_v39, %v2421_v12  ;;  %v2494_v14 = vadd.f32 %v756_v49, %v2343_v40 }
 0x38a   :  { %v718_v47 = vmax.f32 %v701_v28, 1e-24  ;;  %1892 = vmatmul.mubr.bf16.vlgmr.msra.gmra.mxu1 %v804_v30  ;;  %v741_v13 = vmul.f32 %v2086_v46, %v2429_v16 }
 0x38b   :  { %v758_v11 = vmax.f32 %v742_v32, 0.0 }
 0x38c   :  { %2099 = vrsqrt.f32 %v718_v47  ;;  %v2088_v53 = vpop.eup %2087  ;;  %v703_v54 = vpop.xlane.xlu1 %702  ;;  %v757_v3 = vmax.f32 %v741_v13, 0.0 }
 0x38d   :  { %2101 = vrsqrt.f32 %v717_v31  ;;  %v2090_v5 = vpop.eup %2089  ;;  %v719_v7 = vmax.f32 %v703_v54, 1e-24  ;;  %v743_v9 = vmul.f32 %v2088_v53, %v2427_v15  ;;  %v2503_v6 = vadd.f32 %v758_v11, %v2347_v42 }
 0x38e   :  { %v2497_v17 = vadd.f32 %v757_v3, %v2345_v41  ;;  %v744_v12 = vmul.f32 %v2090_v5, %v2437_v21 }
 0x38f   :  { %2103 = vrsqrt.f32 %v719_v7  ;;  %v759_v16 = vmax.f32 %v743_v9, 0.0 }
 0x390   :  { %v805_v19 = vpack.c.bf16 %v2497_v17, %v2494_v14  ;;  %v760_v23 = vmax.f32 %v744_v12, 0.0 }
 0x391   :  { %v2092_v18 = vpop.eup %2091  ;;  %v2506_v15 = vadd.f32 %v759_v16, %v2341_v38 }
 0x392   :  { %v2094_v22 = vpop.eup %2093  ;;  %v746_v40 = vmul.f32 %v2092_v18, %v2435_v20  ;;  %1895 = vmatprep.mubr.bf16.mxu1 %v805_v19  ;;  %v2514_v37 = vadd.f32 %v760_v23, %v2355_v50 }
 0x393   :  { %v745_v41 = vmul.f32 %v2094_v22, %v2445_v26  ;;  %v806_v21 = vpack.c.bf16 %v2506_v15, %v2503_v6  ;;  %v1648_v22 = vld [vmem:[%s2793_s5 + $0x1] ss:$0 sm:$0xff] }
 0x394   :  { %v2096_v4 = vpop.eup %2095  ;;  %v762_v42 = vmax.f32 %v746_v40, 0.0 }
 0x395   :  { %v761_v24 = vmax.f32 %v745_v41, 0.0  ;;  %v2098_v27 = vpop.eup %2097  ;;  %1896 = vmatmul.mubr.bf16.gmra.mxu1 %v806_v21  ;;  %v747_v36 = vmul.f32 %v2096_v4, %v2443_v25 }
 0x396   :  { %v748_v20 = vmul.f32 %v2098_v27, %v2453_v35  ;;  %v2523_v30 = vadd.f32 %v762_v42, %v2359_v52 }
 0x397   :  { %v2517_v38 = vadd.f32 %v761_v24, %v2357_v51  ;;  %v763_v26 = vmax.f32 %v747_v36, 0.0 }
 0x398   :  { %v764_v46 = vmax.f32 %v748_v20, 0.0 }
 0x399   :  { %v2100_v39 = vpop.eup %2099  ;;  %v807_v28 = vpack.c.bf16 %v2517_v38, %v2514_v37  ;;  %v2526_v25 = vadd.f32 %v763_v26, %v2353_v48 }
 0x39a   :  { %v2102_v45 = vpop.eup %2101  ;;  %v750_v50 = vmul.f32 %v2100_v39, %v2451_v34  ;;  %v2534_v52 = vadd.f32 %v764_v46, %v2367_v60 }
 0x39b   :  { %1899 = vmatprep.mubr.bf16.mxu1 %v807_v28  ;;  %v749_v51 = vmul.f32 %v2102_v45, %v2461_v44  ;;  %v808_v35 = vpack.c.bf16 %v2526_v25, %v2523_v30 }
 0x39c   :  { %v2104_v47 = vpop.eup %2103  ;;  %v766_v13 = vmax.f32 %v750_v50, 0.0 }
 0x39d   :  { %v765_v31 = vmax.f32 %v749_v51, 0.0  ;;  %1900 = vmatmul.mubr.bf16.gmra.mxu1 %v808_v35  ;;  %v751_v32 = vmul.f32 %v2104_v47, %v2459_v43 }
 0x39e   :  { %v2542_v49 = vadd.f32 %v766_v13, %v2371_v62 }
 0x39f   :  { %v2537_v48 = vadd.f32 %v765_v31, %v2369_v61  ;;  %v767_v34 = vmax.f32 %v751_v32, 0.0 }
 0x3a1   :  { %v809_v44 = vpack.c.bf16 %v2537_v48, %v2534_v52  ;;  %v2545_v53 = vadd.f32 %v767_v34, %v2365_v58 }
 0x3a3   :  { %1903 = vmatprep.mubr.bf16.mxu1 %v809_v44  ;;  %v810_v43 = vpack.c.bf16 %v2545_v53, %v2542_v49 }
 0x3a5   :  { %1904 = vmatmul.mubr.bf16.gmra.mxu1 %v810_v43 }
 0x44a   :  { %v1893_v60 = vpop.f32.mrf.mxu1 }
 0x44b   :  { %v908_v13 = vadd.f32 %v1893_v60, %v1648_v22 }
 0x44c   :  { %v899_v54 = vpop.f32.mrf.mxu1 }
 0x44d   :  { %v900_v43 = vadd.f32 %v1648_v22, %v899_v54 }
 0x44e   :  { %v1894_v3 = vpop.f32.mrf.mxu1 }
 0x44f   :  { %v911_v31 = vadd.f32 %v1894_v3, %v1648_v22 }
 0x450   :  { %v902_v61 = vpop.f32.mrf.mxu1 }
 0x451   :  { %v963_v34 = vpack.c.bf16 %v911_v31, %v908_v13  ;;  %v903_v44 = vadd.f32 %v1648_v22, %v902_v61 }
 0x455   :  { %v1897_v5 = vpop.f32.mrf.mxu1 }
 0x456   :  { %v924_v51 = vadd.f32 %v1897_v5, %v1648_v22 }
 0x457   :  { %v915_v7 = vpop.f32.mrf.mxu1 }
 0x458   :  { %v916_v47 = vadd.f32 %v1648_v22, %v915_v7 }
 0x459   :  { %v1898_v9 = vpop.f32.mrf.mxu1 }
 0x45a   :  { %v927_v45 = vadd.f32 %v1898_v9, %v1648_v22  ;;  %v962_v9 = vpack.c.bf16 %v903_v44, %v900_v43 }
 0x45b   :  { %v918_v11 = vpop.f32.mrf.mxu1 }
 0x45c   :  { %v965_v46 = vpack.c.bf16 %v927_v45, %v924_v51  ;;  %v919_v35 = vadd.f32 %v1648_v22, %v918_v11  ;;  %v2065_v11 = vld [vmem:[#allocation7 + $0xb8] sm:$0xff]   ;;  %v2070_v51 = vld [vmem:[#allocation7 + $0x90] sm:$0xff]  }
 0x45d   :  { %v1901_v12 = vpop.f32.mrf.mxu1  ;;  %1939 = vmatprep.subr.bf16.mxu1 %v2065_v11 }
 0x45e   :  { %v940_v20 = vadd.f32 %v1901_v12, %v1648_v22  ;;  %v964_v32 = vpack.c.bf16 %v919_v35, %v916_v47  ;;  %1940 = vmatpush3.bf16.msra.mxu1 %v2065_v11  ;;  %v2071_v35 = vld [vmem:[#allocation7 + $0x88] sm:$0xff]   ;;  %v2072_v47 = vld [vmem:[#allocation7 + $0x80] sm:$0xff]  }
 0x45f   :  { %v931_v16 = vpop.f32.mrf.mxu1 }
 0x460   :  { %v932_v28 = vadd.f32 %v1648_v22, %v931_v16 }
 0x461   :  { %v1902_v62 = vpop.f32.mrf.mxu1 }
 0x462   :  { %v943_v36 = vadd.f32 %v1902_v62, %v1648_v22 }
 0x463   :  { %v934_v18 = vpop.f32.mrf.mxu1 }
 0x464   :  { %v967_v26 = vpack.c.bf16 %v943_v36, %v940_v20  ;;  %v935_v39 = vadd.f32 %v1648_v22, %v934_v18  ;;  %v2068_v36 = vld [vmem:[#allocation7 + $0xa0] sm:$0xff]  }
 0x465   :  { %v1905_v19 = vpop.f32.mrf.mxu1 }
 0x466   :  { %v956_v41 = vadd.f32 %v1905_v19, %v1648_v22  ;;  %v966_v50 = vpack.c.bf16 %v935_v39, %v932_v28  ;;  %v2066_v19 = vld [vmem:[#allocation7 + $0xb0] sm:$0xff]   ;;  %v2069_v28 = vld [vmem:[#allocation7 + $0x98] sm:$0xff]  }
 0x467   :  { %v947_v58 = vpop.f32.mrf.mxu1  ;;  %1941 = vmatprep.subr.bf16.mxu1 %v2066_v19 }
 0x468   :  { %v948_v4 = vadd.f32 %v1648_v22, %v947_v58  ;;  %1942 = vmatpush3.bf16.msra.mxu1 %v2066_v19 }
 0x469   :  { %v1906_v40 = vpop.f32.mrf.mxu1 }
 0x46a   :  { %v959_v23 = vadd.f32 %v1906_v40, %v1648_v22 }
 0x46b   :  { %v950_v21 = vpop.f32.mrf.mxu1 }
 0x46c   :  { %v969_v24 = vpack.c.bf16 %v959_v23, %v956_v41  ;;  %v951_v27 = vadd.f32 %v1648_v22, %v950_v21  ;;  %v2067_v23 = vld [vmem:[#allocation7 + $0xa8] sm:$0xff]  }
 0x46d   :  { %1943 = vmatprep.subr.bf16.mxu1 %v2067_v23 }
 0x46e   :  { %v968_v42 = vpack.c.bf16 %v951_v27, %v948_v4  ;;  %1907 = vmatprep.subr.bf16.mxu0 %v969_v24  ;;  %1944 = vmatpush3.bf16.msra.mxu1 %v2067_v23 }
 0x46f   :  { %1908 = vmatpush3.bf16.msra.mxu0 %v969_v24  ;;  %1945 = vmatprep.subr.bf16.mxu1 %v2068_v36 }
 0x470   :  { %1909 = vmatprep.subr.bf16.mxu0 %v968_v42 }
 0x472   :  { %1946 = vmatpush3.bf16.msra.mxu1 %v2068_v36 }
 0x473   :  { %1910 = vmatpush3.bf16.msra.mxu0 %v968_v42  ;;  %1947 = vmatprep.subr.bf16.mxu1 %v2069_v28 }
 0x474   :  { %1911 = vmatprep.subr.bf16.mxu0 %v967_v26 }
 0x476   :  { %1948 = vmatpush3.bf16.msra.mxu1 %v2069_v28 }
 0x477   :  { %1912 = vmatpush3.bf16.msra.mxu0 %v967_v26  ;;  %1949 = vmatprep.subr.bf16.mxu1 %v2070_v51 }
 0x478   :  { %1913 = vmatprep.subr.bf16.mxu0 %v966_v50 }
 0x47a   :  { %1950 = vmatpush3.bf16.msra.mxu1 %v2070_v51 }
 0x47b   :  { %1914 = vmatpush3.bf16.msra.mxu0 %v966_v50  ;;  %1951 = vmatprep.subr.bf16.mxu1 %v2071_v35 }
 0x47c   :  { %1915 = vmatprep.subr.bf16.mxu0 %v965_v46 }
 0x47e   :  { %1952 = vmatpush3.bf16.msra.mxu1 %v2071_v35 }
 0x47f   :  { %1916 = vmatpush3.bf16.msra.mxu0 %v965_v46  ;;  %1953 = vmatprep.subr.bf16.mxu1 %v2072_v47 }
 0x480   :  { %1917 = vmatprep.subr.bf16.mxu0 %v964_v32 }
 0x482   :  { %1954 = vmatpush3.bf16.msra.mxu1 %v2072_v47 }
 0x483   :  { %1918 = vmatpush3.bf16.msra.mxu0 %v964_v32 }
 0x484   :  { %1919 = vmatprep.subr.bf16.mxu0 %v963_v34 }
 0x487   :  { %1920 = vmatpush3.bf16.msra.mxu0 %v963_v34 }
 0x488   :  { %1921 = vmatprep.subr.bf16.mxu0 %v962_v9 }
 0x48b   :  { %1922 = vmatpush3.bf16.msra.mxu0 %v962_v9 }
 0x48e   :  { %1924 = vmatmul.mubr.bf16.vlgmr.msra.gmra.mxu0 %v2383_v55 }
 0x48f   :  { %1927 = vmatprep.mubr.bf16.mxu0 %v2385_v56 }
 0x496   :  { %1928 = vmatmul.mubr.bf16.gmra.mxu0 %v2389_v57 }
 0x497   :  { %1931 = vmatprep.mubr.bf16.mxu0 %v2391_v59 }
 0x49e   :  { %1932 = vmatmul.mubr.bf16.gmra.mxu0 %v2395_v63 }
 0x49f   :  { %1935 = vmatprep.mubr.bf16.mxu0 %v2397_v0 }
 0x4a6   :  { %1936 = vmatmul.mubr.bf16.gmra.mxu0 %v2401_v2 }
 0x4a7   :  { %1987 = vmatprep.mubr.bf16.mxu0 %v2377_v1 }
 0x54e   :  { %v2560_v60 = vpop.f32.mrf.mxu0 }
 0x54f   :  { %v1069_v63 = vmul.f32 %v2560_v60, %v2560_v60 }
 0x550   :  { %v2562_v54 = vpop.f32.mrf.mxu0 }
 0x551   :  { %v1067_v55 = vmul.f32 %v2562_v54, %v2562_v54 }
 0x552   :  { %v2566_v56 = vpop.f32.mrf.mxu0 }
 0x553   :  { %1083 = vadd.xlane.f32.xlu0 %v1067_v55  ;;  %v1070_v3 = vmul.f32 %v2566_v56, %v2566_v56 }
 0x554   :  { %v2568_v57 = vpop.f32.mrf.mxu0 }
 0x555   :  { %v1068_v0 = vmul.f32 %v2568_v57, %v2568_v57 }
 0x556   :  { %v2574_v2 = vpop.f32.mrf.mxu0 }
 0x557   :  { %1087 = vadd.xlane.f32.xlu0 %v1069_v63  ;;  %1085 = vadd.xlane.f32.xlu1 %v1068_v0  ;;  %v1073_v12 = vmul.f32 %v2574_v2, %v2574_v2 }
 0x558   :  { %v2576_v1 = vpop.f32.mrf.mxu0 }
 0x559   :  { %v1071_v61 = vmul.f32 %v2576_v1, %v2576_v1 }
 0x55a   :  { %v2582_v5 = vpop.f32.mrf.mxu0 }
 0x55b   :  { %1089 = vadd.xlane.f32.xlu1 %v1070_v3  ;;  %1091 = vadd.xlane.f32.xlu0 %v1071_v61  ;;  %v1074_v58 = vmul.f32 %v2582_v5, %v2582_v5 }
 0x55c   :  { %v2584_v7 = vpop.f32.mrf.mxu0 }
 0x55d   :  { %v1072_v16 = vmul.f32 %v2584_v7, %v2584_v7 }
 0x55e   :  { %v2590_v62 = vpop.f32.mrf.mxu0 }
 0x55f   :  { %1095 = vadd.xlane.f32.xlu0 %v1073_v12  ;;  %1093 = vadd.xlane.f32.xlu1 %v1072_v16  ;;  %v1077_v21 = vmul.f32 %v2590_v62, %v2590_v62 }
 0x560   :  { %v2592_v18 = vpop.f32.mrf.mxu0 }
 0x561   :  { %v1075_v22 = vmul.f32 %v2592_v18, %v2592_v18 }
 0x562   :  { %v2598_v40 = vpop.f32.mrf.mxu0 }
 0x563   :  { %1097 = vadd.xlane.f32.xlu1 %v1074_v58  ;;  %1099 = vadd.xlane.f32.xlu0 %v1075_v22  ;;  %v1078_v42 = vmul.f32 %v2598_v40, %v2598_v40 }
 0x564   :  { %v2600_v41 = vpop.f32.mrf.mxu0 }
 0x565   :  { %v1076_v4 = vmul.f32 %v2600_v41, %v2600_v41 }
 0x566   :  { %v2606_v24 = vpop.f32.mrf.mxu0 }
 0x567   :  { %1103 = vadd.xlane.f32.xlu0 %v1077_v21  ;;  %1101 = vadd.xlane.f32.xlu1 %v1076_v4  ;;  %v1081_v45 = vmul.f32 %v2606_v24, %v2606_v24 }
 0x568   :  { %v2608_v27 = vpop.f32.mrf.mxu0 }
 0x569   :  { %v1079_v20 = vmul.f32 %v2608_v27, %v2608_v27 }
 0x56a   :  { %v2614_v26 = vpop.f32.mrf.mxu0 }
 0x56b   :  { %1105 = vadd.xlane.f32.xlu1 %v1078_v42  ;;  %1107 = vadd.xlane.f32.xlu0 %v1079_v20  ;;  %v1082_v46 = vmul.f32 %v2614_v26, %v2614_v26 }
 0x56c   :  { %v2616_v39 = vpop.f32.mrf.mxu0 }
 0x56d   :  { %v1080_v50 = vmul.f32 %v2616_v39, %v2616_v39 }
 0x56f   :  { %1111 = vadd.xlane.f32.xlu0 %v1081_v45  ;;  %1109 = vadd.xlane.f32.xlu1 %v1080_v50 }
 0x573   :  { %1113 = vadd.xlane.f32.xlu1 %v1082_v46 }
 0x5dc   :  { %v1084_v31 = vpop.xlane.xlu0 %1083 }
 0x5dd   :  { %v1115_v32 = vmax.f32 %v1084_v31, 1e-24 }
 0x5df   :  { %2105 = vrsqrt.f32 %v1115_v32 }
 0x5e0   :  { %v1088_v13 = vpop.xlane.xlu0 %1087  ;;  %v1086_v34 = vpop.xlane.xlu1 %1085 }
 0x5e1   :  { %v1117_v44 = vmax.f32 %v1088_v13, 1e-24  ;;  %v1116_v43 = vmax.f32 %v1086_v34, 1e-24 }
 0x5e3   :  { %2107 = vrsqrt.f32 %v1117_v44 }
 0x5e4   :  { %2109 = vrsqrt.f32 %v1116_v43  ;;  %v1090_v9 = vpop.xlane.xlu1 %1089  ;;  %v1092_v55 = vpop.xlane.xlu0 %1091 }
 0x5e5   :  { %v1118_v63 = vmax.f32 %v1090_v9, 1e-24  ;;  %v1119_v0 = vmax.f32 %v1092_v55, 1e-24 }
 0x5e7   :  { %2111 = vrsqrt.f32 %v1118_v63 }
 0x5e8   :  { %2113 = vrsqrt.f32 %v1119_v0  ;;  %v1096_v3 = vpop.xlane.xlu0 %1095  ;;  %v1094_v61 = vpop.xlane.xlu1 %1093 }
 0x5e9   :  { %v1121_v11 = vmax.f32 %v1096_v3, 1e-24  ;;  %v1120_v12 = vmax.f32 %v1094_v61, 1e-24 }
 0x5eb   :  { %2115 = vrsqrt.f32 %v1121_v11 }
 0x5ec   :  { %v2106_v16 = vpop.eup %2105  ;;  %2117 = vrsqrt.f32 %v1120_v12  ;;  %v1098_v19 = vpop.xlane.xlu1 %1097 }
 0x5ed   :  { %v1100_v58 = vpop.xlane.xlu0 %1099  ;;  %v1122_v22 = vmax.f32 %v1098_v19, 1e-24  ;;  %v1147_v21 = vmul.f32 %v2106_v16, %v2562_v54 }
 0x5ee   :  { %v1123_v23 = vmax.f32 %v1100_v58, 1e-24 }
 0x5ef   :  { %2119 = vrsqrt.f32 %v1122_v22  ;;  %v1163_v46 = vmax.f32 %v1147_v21, 0.0 }
 0x5f0   :  { %v2108_v4 = vpop.eup %2107  ;;  %2121 = vrsqrt.f32 %v1123_v23  ;;  %v1102_v42 = vpop.xlane.xlu1 %1101 }
 0x5f1   :  { %v1104_v36 = vpop.xlane.xlu0 %1103  ;;  %v2110_v20 = vpop.eup %2109  ;;  %v1149_v28 = vmul.f32 %v2108_v4, %v2560_v60  ;;  %v1124_v50 = vmax.f32 %v1102_v42, 1e-24  ;;  %v1179_v9 = vadd.f32 %v1163_v46, %v2477_v29 }
 0x5f2   :  { %v1125_v45 = vmax.f32 %v1104_v36, 1e-24  ;;  %v1148_v51 = vmul.f32 %v2110_v20, %v2568_v57 }
 0x5f3   :  { %v1165_v47 = vmax.f32 %v1149_v28, 0.0 }
 0x5f4   :  { %2123 = vrsqrt.f32 %v1125_v45  ;;  %v2112_v35 = vpop.eup %2111  ;;  %v1106_v31 = vpop.xlane.xlu1 %1105  ;;  %v1164_v54 = vmax.f32 %v1148_v51, 0.0 }
 0x5f5   :  { %2125 = vrsqrt.f32 %v1124_v50  ;;  %v1108_v32 = vpop.xlane.xlu0 %1107  ;;  %v2114_v13 = vpop.eup %2113  ;;  %v1150_v34 = vmul.f32 %v2112_v35, %v2566_v56  ;;  %v1126_v44 = vmax.f32 %v1106_v31, 1e-24  ;;  %v1181_v11 = vadd.f32 %v1165_v47, %v2483_v10 }
 0x5f6   :  { %v1127_v43 = vmax.f32 %v1108_v32, 1e-24  ;;  %v1180_v60 = vadd.f32 %v1164_v54, %v2480_v33  ;;  %v1151_v55 = vmul.f32 %v2114_v13, %v2576_v1 }
 0x5f7   :  { %v1166_v57 = vmax.f32 %v1150_v34, 0.0  ;;  %2127 = vrsqrt.f32 %v1126_v44 }
 0x5f8   :  { %v2116_v63 = vpop.eup %2115  ;;  %2129 = vrsqrt.f32 %v1127_v43  ;;  %v1110_v3 = vpop.xlane.xlu1 %1109  ;;  %v1214_v61 = vpack.c.bf16 %v1180_v60, %v1179_v9  ;;  %v1167_v1 = vmax.f32 %v1151_v55, 0.0 }
 0x5f9   :  { %v1112_v0 = vpop.xlane.xlu0 %1111  ;;  %v2118_v12 = vpop.eup %2117  ;;  %v1128_v56 = vmax.f32 %v1110_v3, 1e-24  ;;  %v1182_v19 = vadd.f32 %v1166_v57, %v2474_v8  ;;  %v1153_v29 = vmul.f32 %v2116_v63, %v2574_v2 }
 0x5fa   :  { %v1129_v16 = vmax.f32 %v1112_v0, 1e-24  ;;  %1955 = vmatprep.mubr.bf16.mxu1 %v1214_v61  ;;  %v1152_v33 = vmul.f32 %v2118_v12, %v2584_v7  ;;  %v1183_v8 = vadd.f32 %v1167_v1, %v2494_v14 }
 0x5fb   :  { %v1215_v58 = vpack.c.bf16 %v1182_v19, %v1181_v11  ;;  %v1169_v42 = vmax.f32 %v1153_v29, 0.0 }
 0x5fc   :  { %2131 = vrsqrt.f32 %v1129_v16  ;;  %v2120_v22 = vpop.eup %2119  ;;  %v1114_v23 = vpop.xlane.xlu1 %1113  ;;  %v1168_v21 = vmax.f32 %v1152_v33, 0.0 }
 0x5fd   :  { %2133 = vrsqrt.f32 %v1128_v56  ;;  %v2122_v4 = vpop.eup %2121  ;;  %v1130_v36 = vmax.f32 %v1114_v23, 1e-24  ;;  %1956 = vmatmul.mubr.bf16.vlgmr.msra.gmra.mxu1 %v1215_v58  ;;  %v1154_v10 = vmul.f32 %v2120_v22, %v2582_v5  ;;  %v1185_v51 = vadd.f32 %v1169_v42, %v2503_v6 }
 0x5fe   :  { %v1184_v2 = vadd.f32 %v1168_v21, %v2497_v17  ;;  %v1155_v20 = vmul.f32 %v2122_v4, %v2592_v18 }
 0x5ff   :  { %2135 = vrsqrt.f32 %v1130_v36  ;;  %v1170_v7 = vmax.f32 %v1154_v10, 0.0 }
 0x600   :  { %v1216_v45 = vpack.c.bf16 %v1184_v2, %v1183_v8  ;;  %v1171_v47 = vmax.f32 %v1155_v20, 0.0 }
 0x601   :  { %v2124_v28 = vpop.eup %2123  ;;  %v1186_v46 = vadd.f32 %v1170_v7, %v2506_v15 }
 0x602   :  { %v2126_v50 = vpop.eup %2125  ;;  %v1157_v35 = vmul.f32 %v2124_v28, %v2590_v62  ;;  %1959 = vmatprep.mubr.bf16.mxu1 %v1216_v45  ;;  %v1187_v13 = vadd.f32 %v1171_v47, %v2514_v37 }
 0x603   :  { %v1156_v5 = vmul.f32 %v2126_v50, %v2600_v41  ;;  %v1217_v14 = vpack.c.bf16 %v1186_v46, %v1185_v51 }
 0x604   :  { %v2128_v31 = vpop.eup %2127  ;;  %v1173_v54 = vmax.f32 %v1157_v35, 0.0 }
 0x605   :  { %v1172_v17 = vmax.f32 %v1156_v5, 0.0  ;;  %v2130_v32 = vpop.eup %2129  ;;  %1960 = vmatmul.mubr.bf16.gmra.mxu1 %v1217_v14  ;;  %v1158_v18 = vmul.f32 %v2128_v31, %v2598_v40 }
 0x606   :  { %v1159_v15 = vmul.f32 %v2130_v32, %v2608_v27  ;;  %v1189_v41 = vadd.f32 %v1173_v54, %v2523_v30 }
 0x607   :  { %v1188_v6 = vadd.f32 %v1172_v17, %v2517_v38  ;;  %v1174_v34 = vmax.f32 %v1158_v18, 0.0 }
 0x608   :  { %v1175_v55 = vmax.f32 %v1159_v15, 0.0  ;;  %v2170_v15 = vld [vmem:[#allocation4 + $0x28] sm:$0xff]  }
 0x609   :  { %v2132_v62 = vpop.eup %2131  ;;  %v1218_v44 = vpack.c.bf16 %v1188_v6, %v1187_v13  ;;  %v1190_v9 = vadd.f32 %v1174_v34, %v2526_v25  ;;  %v2169_v6 = vld [vmem:[#allocation4 + $0x8] sm:$0xff]   ;;  %v2171_v34 = vld [vmem:[#allocation4 + $0x10] sm:$0xff]  }
 0x60a   :  { %v2134_v43 = vpop.eup %2133  ;;  %v1161_v60 = vmul.f32 %v2132_v62, %v2606_v24  ;;  %v1191_v0 = vadd.f32 %v1175_v55, %v2534_v52  ;;  %v2172_v62 = vld [vmem:[#allocation4 + $0x30] sm:$0xff]  }
 0x60b   :  { %1963 = vmatprep.mubr.bf16.mxu1 %v1218_v44  ;;  %v1160_v40 = vmul.f32 %v2134_v43, %v2616_v39  ;;  %v1219_v57 = vpack.c.bf16 %v1190_v9, %v1189_v41  ;;  %v2173_v44 = vld [vmem:[#allocation4 + $0x18] sm:$0xff]  }
 0x60c   :  { %v2136_v37 = vpop.eup %2135  ;;  %v1177_v27 = vmax.f32 %v1161_v60, 0.0  ;;  %v2174_v43 = vld [vmem:[#allocation4 + $0x38] sm:$0xff]  }
 0x60d   :  { %v1176_v63 = vmax.f32 %v1160_v40, 0.0  ;;  %1964 = vmatmul.mubr.bf16.gmra.mxu1 %v1219_v57  ;;  %v1162_v38 = vmul.f32 %v2136_v37, %v2614_v26 }
 0x60e   :  { %v1193_v25 = vadd.f32 %v1177_v27, %v2542_v49 }
 0x60f   :  { %v1192_v3 = vadd.f32 %v1176_v63, %v2537_v48  ;;  %v1178_v30 = vmax.f32 %v1162_v38, 0.0 }
 0x611   :  { %v1220_v61 = vpack.c.bf16 %v1192_v3, %v1191_v0  ;;  %v1194_v24 = vadd.f32 %v1178_v30, %v2545_v53  ;;  %v1658_v53 = vld [vmem:[%s2793_s5 + $0x2] ss:$0 sm:$0xff] }
 0x613   :  { %1967 = vmatprep.mubr.bf16.mxu1 %v1220_v61  ;;  %v1221_v39 = vpack.c.bf16 %v1194_v24, %v1193_v25 }
 0x615   :  { %1968 = vmatmul.mubr.bf16.gmra.mxu1 %v1221_v39 }
 0x616   :  { %1995 = vmatprep.mubr.bf16.mxu1 %v2391_v59 }
 0x6bd   :  { %v1957_v11 = vpop.f32.mrf.mxu1 }
 0x6be   :  { %v1319_v17 = vadd.f32 %v1957_v11, %v1658_v53 }
 0x6bf   :  { %v1310_v12 = vpop.f32.mrf.mxu1 }
 0x6c0   :  { %v1311_v54 = vadd.f32 %v1658_v53, %v1310_v12 }
 0x6c1   :  { %v1958_v16 = vpop.f32.mrf.mxu1 }
 0x6c2   :  { %v1322_v14 = vadd.f32 %v1958_v16, %v1658_v53 }
 0x6c3   :  { %v1313_v26 = vpop.f32.mrf.mxu1 }
 0x6c4   :  { %v1374_v32 = vpack.c.bf16 %v1322_v14, %v1319_v17  ;;  %v1314_v18 = vadd.f32 %v1658_v53, %v1313_v26 }
 0x6c5   :  { %v1961_v56 = vpop.f32.mrf.mxu1 }
 0x6c6   :  { %v1335_v46 = vadd.f32 %v1961_v56, %v1658_v53  ;;  %v1373_v13 = vpack.c.bf16 %v1314_v18, %v1311_v54 }
 0x6c7   :  { %v1326_v19 = vpop.f32.mrf.mxu1 }
 0x6c8   :  { %v1327_v47 = vadd.f32 %v1658_v53, %v1326_v19 }
 0x6c9   :  { %v1962_v52 = vpop.f32.mrf.mxu1 }
 0x6ca   :  { %v1338_v50 = vadd.f32 %v1962_v52, %v1658_v53 }
 0x6cb   :  { %v1329_v29 = vpop.f32.mrf.mxu1 }
 0x6cc   :  { %v1376_v35 = vpack.c.bf16 %v1338_v50, %v1335_v46  ;;  %v1330_v5 = vadd.f32 %v1658_v53, %v1329_v29 }
 0x6cd   :  { %v1965_v48 = vpop.f32.mrf.mxu1 }
 0x6ce   :  { %v1351_v20 = vadd.f32 %v1965_v48, %v1658_v53  ;;  %v1375_v31 = vpack.c.bf16 %v1330_v5, %v1327_v47 }
 0x6cf   :  { %v1342_v33 = vpop.f32.mrf.mxu1 }
 0x6d0   :  { %v1343_v45 = vadd.f32 %v1658_v53, %v1342_v33 }
 0x6d1   :  { %v1966_v1 = vpop.f32.mrf.mxu1 }
 0x6d2   :  { %v1354_v8 = vadd.f32 %v1966_v1, %v1658_v53 }
 0x6d3   :  { %v1345_v58 = vpop.f32.mrf.mxu1 }
 0x6d4   :  { %v1378_v7 = vpack.c.bf16 %v1354_v8, %v1351_v20  ;;  %v1346_v28 = vadd.f32 %v1658_v53, %v1345_v58 }
 0x6d5   :  { %v1969_v49 = vpop.f32.mrf.mxu1 }
 0x6d6   :  { %v1367_v59 = vadd.f32 %v1969_v49, %v1658_v53  ;;  %v1377_v51 = vpack.c.bf16 %v1346_v28, %v1343_v45 }
 0x6d7   :  { %v1358_v22 = vpop.f32.mrf.mxu1 }
 0x6d8   :  { %v1359_v36 = vadd.f32 %v1658_v53, %v1358_v22 }
 0x6d9   :  { %v1970_v23 = vpop.f32.mrf.mxu1 }
 0x6da   :  { %v1370_v21 = vadd.f32 %v1970_v23, %v1658_v53 }
 0x6db   :  { %v1361_v4 = vpop.f32.mrf.mxu1 }
 0x6dc   :  { %v1380_v10 = vpack.c.bf16 %v1370_v21, %v1367_v59  ;;  %v1362_v42 = vadd.f32 %v1658_v53, %v1361_v4 }
 0x6de   :  { %v1379_v2 = vpack.c.bf16 %v1362_v42, %v1359_v36  ;;  %1971 = vmatprep.subr.bf16.mxu0 %v1380_v10  ;;  %2003 = vmatprep.subr.bf16.mxu1 %v1380_v10 }
 0x6df   :  { %1972 = vmatpush3.bf16.msra.mxu0 %v1380_v10  ;;  %2011 = vmatpush3.bf16.msra.mxu1 %v1380_v10 }
 0x6e0   :  { %1973 = vmatprep.subr.bf16.mxu0 %v1379_v2  ;;  %2004 = vmatprep.subr.bf16.mxu1 %v1379_v2 }
 0x6e3   :  { %1974 = vmatpush3.bf16.msra.mxu0 %v1379_v2  ;;  %2012 = vmatpush3.bf16.msra.mxu1 %v1379_v2 }
 0x6e4   :  { %1975 = vmatprep.subr.bf16.mxu0 %v1378_v7  ;;  %2005 = vmatprep.subr.bf16.mxu1 %v1378_v7 }
 0x6e7   :  { %1976 = vmatpush3.bf16.msra.mxu0 %v1378_v7  ;;  %2013 = vmatpush3.bf16.msra.mxu1 %v1378_v7 }
 0x6e8   :  { %1977 = vmatprep.subr.bf16.mxu0 %v1377_v51  ;;  %2006 = vmatprep.subr.bf16.mxu1 %v1377_v51 }
 0x6eb   :  { %1978 = vmatpush3.bf16.msra.mxu0 %v1377_v51  ;;  %2014 = vmatpush3.bf16.msra.mxu1 %v1377_v51 }
 0x6ec   :  { %1979 = vmatprep.subr.bf16.mxu0 %v1376_v35  ;;  %2007 = vmatprep.subr.bf16.mxu1 %v1376_v35 }
 0x6ef   :  { %1980 = vmatpush3.bf16.msra.mxu0 %v1376_v35  ;;  %2015 = vmatpush3.bf16.msra.mxu1 %v1376_v35 }
 0x6f0   :  { %1981 = vmatprep.subr.bf16.mxu0 %v1375_v31  ;;  %2008 = vmatprep.subr.bf16.mxu1 %v1375_v31 }
 0x6f3   :  { %1982 = vmatpush3.bf16.msra.mxu0 %v1375_v31  ;;  %2016 = vmatpush3.bf16.msra.mxu1 %v1375_v31 }
 0x6f4   :  { %1983 = vmatprep.subr.bf16.mxu0 %v1374_v32  ;;  %2009 = vmatprep.subr.bf16.mxu1 %v1374_v32 }
 0x6f7   :  { %1984 = vmatpush3.bf16.msra.mxu0 %v1374_v32  ;;  %2017 = vmatpush3.bf16.msra.mxu1 %v1374_v32 }
 0x6f8   :  { %1985 = vmatprep.subr.bf16.mxu0 %v1373_v13  ;;  %2010 = vmatprep.subr.bf16.mxu1 %v1373_v13 }
 0x6fb   :  { %1986 = vmatpush3.bf16.msra.mxu0 %v1373_v13  ;;  %2018 = vmatpush3.bf16.msra.mxu1 %v1373_v13 }
 0x6fe   :  { %1988 = vmatmul.mubr.bf16.vlgmr.msra.gmra.mxu0 %v2169_v6  ;;  %1996 = vmatmul.mubr.bf16.vlgmr.msra.gmra.mxu1 %v2170_v15 }
 0x6ff   :  { %1991 = vmatprep.mubr.bf16.mxu0 %v2171_v34  ;;  %1999 = vmatprep.mubr.bf16.mxu1 %v2172_v62 }
 0x706   :  { %1992 = vmatmul.mubr.bf16.gmra.mxu0 %v2173_v44  ;;  %2000 = vmatmul.mubr.bf16.gmra.mxu1 %v2174_v43 }
 0x7be   :  { %v2660_v41 = vpop.f32.mrf.mxu0  ;;  %v2662_v9 = vpop.f32.mrf.mxu1 }
 0x7bf   :  { %v1480_v60 = vmul.f32 %v2660_v41, %v2660_v41  ;;  %v1488_v57 = vmul.f32 %v2662_v9, %v2662_v9 }
 0x7c0   :  { %v2666_v40 = vpop.f32.mrf.mxu0  ;;  %v2668_v55 = vpop.f32.mrf.mxu1 }
 0x7c1   :  { %1498 = vadd.xlane.f32.xlu0 %v1480_v60  ;;  %v1478_v0 = vmul.f32 %v2666_v40, %v2666_v40  ;;  %v1486_v25 = vmul.f32 %v2668_v55, %v2668_v55 }
 0x7c2   :  { %v2672_v37 = vpop.f32.mrf.mxu0  ;;  %v2676_v38 = vpop.f32.mrf.mxu1 }
 0x7c3   :  { %v1481_v63 = vmul.f32 %v2672_v37, %v2672_v37  ;;  %v1489_v3 = vmul.f32 %v2676_v38, %v2676_v38 }
 0x7c4   :  { %v2678_v27 = vpop.f32.mrf.mxu0  ;;  %v2686_v61 = vpop.f32.mrf.mxu1 }
 0x7c5   :  { %1514 = vadd.xlane.f32.xlu0 %v1488_v57  ;;  %1500 = vadd.xlane.f32.xlu1 %v1481_v63  ;;  %v1479_v24 = vmul.f32 %v2678_v27, %v2678_v27  ;;  %v1487_v16 = vmul.f32 %v2686_v61, %v2686_v61 }
 0x7c6   :  { %v2684_v30 = vpop.f32.mrf.mxu0  ;;  %v2694_v11 = vpop.f32.mrf.mxu1 }
 0x7c7   :  { %v1484_v12 = vmul.f32 %v2684_v30, %v2684_v30  ;;  %v1492_v22 = vmul.f32 %v2694_v11, %v2694_v11 }
 0x7c8   :  { %v2692_v39 = vpop.f32.mrf.mxu0  ;;  %v2702_v56 = vpop.f32.mrf.mxu1 }
 0x7c9   :  { %1494 = vadd.xlane.f32.xlu0 %v1478_v0  ;;  %1516 = vadd.xlane.f32.xlu1 %v1489_v3  ;;  %v1482_v19 = vmul.f32 %v2692_v39, %v2692_v39  ;;  %v1490_v1 = vmul.f32 %v2702_v56, %v2702_v56 }
 0x7ca   :  { %v2700_v26 = vpop.f32.mrf.mxu0  ;;  %v2710_v48 = vpop.f32.mrf.mxu1 }
 0x7cb   :  { %v1485_v52 = vmul.f32 %v2700_v26, %v2700_v26  ;;  %v1493_v53 = vmul.f32 %v2710_v48, %v2710_v48 }
 0x7cc   :  { %v2708_v29 = vpop.f32.mrf.mxu0  ;;  %v2716_v58 = vpop.f32.mrf.mxu1 }
 0x7cd   :  { %1510 = vadd.xlane.f32.xlu0 %v1486_v25  ;;  %1496 = vadd.xlane.f32.xlu1 %v1479_v24  ;;  %v1483_v33 = vmul.f32 %v2708_v29, %v2708_v29  ;;  %v1491_v49 = vmul.f32 %v2716_v58, %v2716_v58 }
 0x7d1   :  { %1512 = vadd.xlane.f32.xlu1 %v1487_v16  ;;  %1506 = vadd.xlane.f32.xlu0 %v1484_v12 }
 0x7d5   :  { %1502 = vadd.xlane.f32.xlu0 %v1482_v19  ;;  %1508 = vadd.xlane.f32.xlu1 %v1485_v52 }
 0x7d9   :  { %1518 = vadd.xlane.f32.xlu0 %v1490_v1  ;;  %1504 = vadd.xlane.f32.xlu1 %v1483_v33 }
 0x7dd   :  { %1522 = vadd.xlane.f32.xlu0 %v1492_v22  ;;  %1520 = vadd.xlane.f32.xlu1 %v1491_v49 }
 0x7e1   :  { %1524 = vadd.xlane.f32.xlu1 %v1493_v53 }
 0x84a   :  { %v1499_v23 = vpop.xlane.xlu0 %1498 }
 0x84b   :  { %v1528_v59 = vmax.f32 %v1499_v23, 1e-24 }
 0x84d   :  { %2137 = vrsqrt.f32 %v1528_v59 }
 0x84e   :  { %v1515_v21 = vpop.xlane.xlu0 %1514  ;;  %v1501_v4 = vpop.xlane.xlu1 %1500 }
 0x84f   :  { %v1536_v36 = vmax.f32 %v1515_v21, 1e-24  ;;  %v1529_v10 = vmax.f32 %v1501_v4, 1e-24 }
 0x851   :  { %2139 = vrsqrt.f32 %v1536_v36 }
 0x852   :  { %2141 = vrsqrt.f32 %v1529_v10  ;;  %v1495_v42 = vpop.xlane.xlu0 %1494  ;;  %v1517_v8 = vpop.xlane.xlu1 %1516 }
 0x853   :  { %v1526_v2 = vmax.f32 %v1495_v42, 1e-24  ;;  %v1537_v20 = vmax.f32 %v1517_v8, 1e-24 }
 0x855   :  { %2143 = vrsqrt.f32 %v1526_v2 }
 0x856   :  { %2145 = vrsqrt.f32 %v1537_v20  ;;  %v1511_v7 = vpop.xlane.xlu0 %1510  ;;  %v1497_v28 = vpop.xlane.xlu1 %1496 }
 0x857   :  { %v1534_v45 = vmax.f32 %v1511_v7, 1e-24  ;;  %v1527_v50 = vmax.f32 %v1497_v28, 1e-24 }
 0x859   :  { %2147 = vrsqrt.f32 %v1534_v45 }
 0x85a   :  { %v2138_v51 = vpop.eup %2137  ;;  %2149 = vrsqrt.f32 %v1527_v50  ;;  %v1513_v46 = vpop.xlane.xlu1 %1512 }
 0x85b   :  { %v1507_v35 = vpop.xlane.xlu0 %1506  ;;  %v1560_v5 = vmul.f32 %v2138_v51, %v2660_v41  ;;  %v1535_v47 = vmax.f32 %v1513_v46, 1e-24 }
 0x85c   :  { %v1532_v14 = vmax.f32 %v1507_v35, 1e-24 }
 0x85d   :  { %v1576_v31 = vmax.f32 %v1560_v5, 0.0  ;;  %2151 = vrsqrt.f32 %v1535_v47 }
 0x85e   :  { %v2140_v17 = vpop.eup %2139  ;;  %2153 = vrsqrt.f32 %v1532_v14  ;;  %v1509_v18 = vpop.xlane.xlu1 %1508 }
 0x85f   :  { %v1503_v32 = vpop.xlane.xlu0 %1502  ;;  %v2142_v54 = vpop.eup %2141  ;;  %1592 = vst [vmem:[%s2794_s6 + $0x10] sm:$0xff] %v1576_v31  ;;  %v1568_v13 = vmul.f32 %v2140_v17, %v2662_v9  ;;  %v1533_v15 = vmax.f32 %v1509_v18, 1e-24 }
 0x860   :  { %v1530_v6 = vmax.f32 %v1503_v32, 1e-24  ;;  %v1561_v34 = vmul.f32 %v2142_v54, %v2672_v37 }
 0x861   :  { %v1584_v62 = vmax.f32 %v1568_v13, 0.0 }
 0x862   :  { %2155 = vrsqrt.f32 %v1530_v6  ;;  %v2144_v44 = vpop.eup %2143  ;;  %v1577_v43 = vmax.f32 %v1561_v34, 0.0  ;;  %v1505_v60 = vpop.xlane.xlu1 %1504 }
 0x863   :  { %2157 = vrsqrt.f32 %v1533_v15  ;;  %v1519_v41 = vpop.xlane.xlu0 %1518  ;;  %v2146_v57 = vpop.eup %2145  ;;  %1600 = vst [vmem:[%s2794_s6 + $0x50] sm:$0xff] %v1584_v62  ;;  %v1558_v63 = vmul.f32 %v2144_v44, %v2666_v40  ;;  %v1531_v9 = vmax.f32 %v1505_v60, 1e-24 }
 0x864   :  { %v1538_v0 = vmax.f32 %v1519_v41, 1e-24  ;;  %1593 = vst [vmem:[%s2794_s6 + $0x18] sm:$0xff] %v1577_v43  ;;  %v1569_v37 = vmul.f32 %v2146_v57, %v2676_v38 }
 0x865   :  { %v1574_v3 = vmax.f32 %v1558_v63, 0.0 }
 0x866   :  { %2159 = vrsqrt.f32 %v1538_v0  ;;  %v2148_v25 = vpop.eup %2147  ;;  %v1585_v24 = vmax.f32 %v1569_v37, 0.0  ;;  %v1521_v16 = vpop.xlane.xlu1 %1520 }
 0x867   :  { %2161 = vrsqrt.f32 %v1531_v9  ;;  %v1523_v12 = vpop.xlane.xlu0 %1522  ;;  %v2150_v19 = vpop.eup %2149  ;;  %1590 = vst [vmem:[%s2794_s6] sm:$0xff] %v1574_v3  ;;  %v1566_v40 = vmul.f32 %v2148_v25, %v2668_v55  ;;  %v1539_v33 = vmax.f32 %v1521_v16, 1e-24 }
 0x868   :  { %v1540_v52 = vmax.f32 %v1523_v12, 1e-24  ;;  %1601 = vst [vmem:[%s2794_s6 + $0x58] sm:$0xff] %v1585_v24  ;;  %v1559_v38 = vmul.f32 %v2150_v19, %v2678_v27 }
 0x869   :  { %v1582_v1 = vmax.f32 %v1566_v40, 0.0 }
 0x86a   :  { %2163 = vrsqrt.f32 %v1540_v52  ;;  %v2152_v49 = vpop.eup %2151  ;;  %v1575_v22 = vmax.f32 %v1559_v38, 0.0  ;;  %v1525_v53 = vpop.xlane.xlu1 %1524 }
 0x86b   :  { %2165 = vrsqrt.f32 %v1539_v33  ;;  %v2154_v23 = vpop.eup %2153  ;;  %1598 = vst [vmem:[%s2794_s6 + $0x40] sm:$0xff] %v1582_v1  ;;  %v1567_v55 = vmul.f32 %v2152_v49, %v2686_v61  ;;  %v1541_v59 = vmax.f32 %v1525_v53, 1e-24 }
 0x86c   :  { %1591 = vst [vmem:[%s2794_s6 + $0x8] sm:$0xff] %v1575_v22  ;;  %v1564_v27 = vmul.f32 %v2154_v23, %v2684_v30 }
 0x86d   :  { %v1583_v21 = vmax.f32 %v1567_v55, 0.0  ;;  %2167 = vrsqrt.f32 %v1541_v59 }
 0x86e   :  { %v1580_v36 = vmax.f32 %v1564_v27, 0.0 }
 0x86f   :  { %v2156_v4 = vpop.eup %2155  ;;  %1599 = vst [vmem:[%s2794_s6 + $0x48] sm:$0xff] %v1583_v21 }
 0x870   :  { %v2158_v10 = vpop.eup %2157  ;;  %v1562_v42 = vmul.f32 %v2156_v4, %v2692_v39  ;;  %1596 = vst [vmem:[%s2794_s6 + $0x30] sm:$0xff] %v1580_v36 }
 0x871   :  { %v1565_v61 = vmul.f32 %v2158_v10, %v2700_v26 }
 0x872   :  { %v1578_v8 = vmax.f32 %v1562_v42, 0.0 }
 0x873   :  { %v2160_v2 = vpop.eup %2159  ;;  %v1581_v30 = vmax.f32 %v1565_v61, 0.0 }
 0x874   :  { %v2162_v20 = vpop.eup %2161  ;;  %1594 = vst [vmem:[%s2794_s6 + $0x20] sm:$0xff] %v1578_v8  ;;  %v1570_v7 = vmul.f32 %v2160_v2, %v2702_v56 }
 0x875   :  { %1597 = vst [vmem:[%s2794_s6 + $0x38] sm:$0xff] %v1581_v30  ;;  %v1563_v39 = vmul.f32 %v2162_v20, %v2708_v29 }
 0x876   :  { %v1586_v28 = vmax.f32 %v1570_v7, 0.0 }
 0x877   :  { %v2164_v45 = vpop.eup %2163  ;;  %v1579_v50 = vmax.f32 %v1563_v39, 0.0 }
 0x878   :  { %v2166_v26 = vpop.eup %2165  ;;  %1602 = vst [vmem:[%s2794_s6 + $0x60] sm:$0xff] %v1586_v28  ;;  %v1572_v51 = vmul.f32 %v2164_v45, %v2694_v11 }
 0x879   :  { %1595 = vst [vmem:[%s2794_s6 + $0x28] sm:$0xff] %v1579_v50  ;;  %v1571_v56 = vmul.f32 %v2166_v26, %v2716_v58 }
 0x87a   :  { %v1588_v46 = vmax.f32 %v1572_v51, 0.0  ;;  %v2168_v35 = vpop.eup %2167 }
 0x87b   :  { %v1587_v5 = vmax.f32 %v1571_v56, 0.0  ;;  %v1573_v29 = vmul.f32 %v2168_v35, %v2710_v48 }
 0x87c   :  { %1604 = vst [vmem:[%s2794_s6 + $0x70] sm:$0xff] %v1588_v46 }
 0x87d   :  { %1603 = vst [vmem:[%s2794_s6 + $0x68] sm:$0xff] %v1587_v5  ;;  %v1589_v11 = vmax.f32 %v1573_v29, 0.0 }
 0x87f   :  { %1605 = vst [vmem:[%s2794_s6 + $0x78] sm:$0xff] %v1589_v11 }
 0x880   :  { %1610 = vsyncpa [#allocation3], 1 }
 0x881   :  { %1611 = vsyncpa [#allocation5], 1 }
 0x882   :  { %1612 = vsyncpa [#allocation8], 1 }

</bundles_post_ra>
